<compile_context>
chip_gen: v5e
topology: v5e:2x2
jax: 0.10.0
libtpu: 0.0.40
codegen_flags: <defaults>
</compile_context>

<pallas_src>
import numpy as np
import jax
import jax.numpy as jnp
from jax import lax
from jax.experimental import pallas as pl
from jax.experimental.pallas import tpu as pltpu


# --------------------------- slab layout helpers ------------------------------
def _round_up(x, m=8):
    return (x + m - 1) // m * m


def _slab_layout(E, H):
    """Row offsets of each weight section inside the single [R, 8H] f32 slab.
    All section starts are multiples of 8 so in-kernel slices are sublane-aligned."""
    R_WIN = 0                       # [2E, 8H]  input projection (fwd rows 0:E, bwd E:2E)
    R_WREC = R_WIN + 2 * E          # [2H, 8H]  block-diagonal recurrent weights
    R_GB = R_WREC + 2 * H           # [1, 8H]   combined gate bias (b_ih + b_hh)
    R_FCE = _round_up(R_GB + 1)     # [E, C]    fc weight, embedding part (cols 0:C)
    R_FCH = R_FCE + E               # [2H, C]   fc weight, [h_fwd | h_bwd] part
    R_FCB = R_FCH + 2 * H           # [1, C]    fc bias
    R_TOT = _round_up(R_FCB + 1)
    return dict(R_WIN=R_WIN, R_WREC=R_WREC, R_GB=R_GB,
                R_FCE=R_FCE, R_FCH=R_FCH, R_FCB=R_FCB, R_TOT=R_TOT)


def _pack_gate_cols(gf, gb, H):
    """Map two (i,f,g,o)-ordered [.., 4H] blocks (fwd, bwd) onto the interleaved
    per-gate column layout [i_f,i_b,f_f,f_b,o_f,o_b,g_f,g_b] -> [.., 8H]."""
    pieces = []
    for k in (0, 1, 3, 2):            # i, f, o, g
        pieces.append(gf[..., k * H:(k + 1) * H])
        pieces.append(gb[..., k * H:(k + 1) * H])
    return jnp.concatenate(pieces, axis=-1)


def pack_params(params):
    """One-time weight re-layout (glue, outside the jitted forward)."""
    E = params["wih_f"].shape[0]
    H = params["wih_f"].shape[1] // 4
    C = params["fc_w"].shape[1]
    G = 8 * H
    L = _slab_layout(E, H)
    zE = jnp.zeros((E, 4 * H), jnp.float32)
    zH = jnp.zeros((H, 4 * H), jnp.float32)
    w_in = jnp.concatenate([_pack_gate_cols(params["wih_f"], zE, H),
                            _pack_gate_cols(zE, params["wih_b"], H)], axis=0)   # [2E, 8H]
    w_rec = jnp.concatenate([_pack_gate_cols(params["whh_f"], zH, H),
                             _pack_gate_cols(zH, params["whh_b"], H)], axis=0)  # [2H, 8H]
    gbias = _pack_gate_cols(params["b_f"], params["b_b"], H)                    # [1, 8H]

    slab = jnp.zeros((L["R_TOT"], G), jnp.float32)
    slab = slab.at[L["R_WIN"]:L["R_WIN"] + 2 * E, :].set(w_in)
    slab = slab.at[L["R_WREC"]:L["R_WREC"] + 2 * H, :].set(w_rec)
    slab = slab.at[L["R_GB"]:L["R_GB"] + 1, :].set(gbias)
    slab = slab.at[L["R_FCE"]:L["R_FCE"] + E, 0:C].set(params["fc_w"][0:E])
    slab = slab.at[L["R_FCH"]:L["R_FCH"] + 2 * H, 0:C].set(params["fc_w"][E:E + 2 * H])
    slab = slab.at[L["R_FCB"]:L["R_FCB"] + 1, 0:C].set(params["fc_b"])
    return slab


# ----------------------------- kernel + wrapper --------------------------------
def build_forward(E, H, T, B, C):
    L = _slab_layout(E, H)
    PB = 8                                   # per-step rows padded to sublane count
    prec = lax.Precision.DEFAULT             # single-pass bf16 MXU (see review item 4)

    def kernel(tok_ref, tab_ref, slab_ref, out_ref, ef_ref, eb_ref):
        # tok_ref : SMEM [B, T] int32
        # tab_ref : VMEM [V, E] f32 embedding table
        # slab_ref: VMEM [R_TOT, 8H] f32 packed weights (layout in _slab_layout)
        # ef_ref  : VMEM [T*8, E] scratch, fwd-time embedding (8 rows / step, rows>=B zero)
        # eb_ref  : VMEM [T*8, E] scratch, time-reversed embedding

        # Zero the scratch so padding rows (b >= B) are well defined.
        ef_ref[...] = jnp.zeros_like(ef_ref)
        eb_ref[...] = jnp.zeros_like(eb_ref)

        # In-kernel embedding gather; each timestep owns an aligned 8-row block.
        for s in range(T):
            for b in range(B):
                tok = tok_ref[b, s]                          # SMEM scalar read
                row = tab_ref[pl.ds(tok, 1), :]              # dynamic row gather, [1, E]
                rf = s * PB + b
                rb = (T - 1 - s) * PB + b
                ef_ref[rf:rf + 1, :] = row
                eb_ref[rb:rb + 1, :] = row

        ef = ef_ref[...]                                     # [T*8, E]
        eb = eb_ref[...]

        # Hoisted input projection for all timesteps and both directions (off the
        # serial path): fwd-time rows drive the fwd gate columns, reversed-time rows
        # drive the bwd gate columns.
        xproj = (jnp.dot(ef, slab_ref[L["R_WIN"]:L["R_WIN"] + E, :],
                         precision=prec, preferred_element_type=jnp.float32)
                 + jnp.dot(eb, slab_ref[L["R_WIN"] + E:L["R_WIN"] + 2 * E, :],
                           precision=prec, preferred_element_type=jnp.float32)
                 + slab_ref[L["R_GB"]:L["R_GB"] + 1, :])     # [T*8, 8H]

        w_rec = slab_ref[L["R_WREC"]:L["R_WREC"] + 2 * H, :]  # [2H, 8H] block diagonal

        h = jnp.zeros((PB, 2 * H), jnp.float32)              # [h_fwd | h_bwd]
        c = jnp.zeros((PB, 2 * H), jnp.float32)
        mx = jnp.zeros((PB, 2 * H), jnp.float32)             # running max of relu(h_t)

        # Fused bidirectional recurrence, fully unrolled (T static & small).
        # Per step: one [8,2H] x [2H,8H] matmul + elementwise; all slices 8-row aligned.
        for s in range(T):
            gates = xproj[s * PB:(s + 1) * PB, :] + jnp.dot(
                h, w_rec, precision=prec, preferred_element_type=jnp.float32)
            sig = jax.nn.sigmoid(gates)                      # full-width EUP pass
            i_g = sig[:, 0:2 * H]                            # [i_f | i_b]
            f_g = sig[:, 2 * H:4 * H]                        # [f_f | f_b]
            o_g = sig[:, 4 * H:6 * H]                        # [o_f | o_b]
            g_g = jnp.tanh(gates[:, 6 * H:8 * H])            # [g_f | g_b]
            c = f_g * c + i_g * g_g
            h = o_g * jnp.tanh(c)
            mx = jnp.maximum(mx, h)    # zero init => max_t relu(h_t)

        # relu + maxpool over time of the embedding part (aligned 8-row blocks).
        emb_max = ef[0:PB, :]
        for s in range(1, T):
            emb_max = jnp.maximum(emb_max, ef[s * PB:(s + 1) * PB, :])
        emb_max = jnp.maximum(emb_max, 0.0)                  # [8, E]

        # FC over [emb_max | h_fwd_max | h_bwd_max]; full 256-lane dots (cols >= C are
        # zero weights), slice valid rows/cols at the single store.
        logits = (jnp.dot(emb_max, slab_ref[L["R_FCE"]:L["R_FCE"] + E, :],
                          precision=prec, preferred_element_type=jnp.float32)
                  + jnp.dot(mx, slab_ref[L["R_FCH"]:L["R_FCH"] + 2 * H, :],
                            precision=prec, preferred_element_type=jnp.float32)
                  + slab_ref[L["R_FCB"]:L["R_FCB"] + 1, :])
        out_ref[...] = logits[0:B, 0:C]

    smem = pl.BlockSpec(memory_space=pltpu.MemorySpace.SMEM)
    vmem = pl.BlockSpec(memory_space=pltpu.MemorySpace.VMEM)

    @jax.jit
    def forward(inputs, emb_table, slab):
        tokens, _seq_len = inputs                 # mirrors `x, _ = x`
        return pl.pallas_call(
            kernel,
            out_shape=jax.ShapeDtypeStruct((B, C), jnp.float32),
            in_specs=[smem, vmem, vmem],
            out_specs=vmem,
            scratch_shapes=[pltpu.VMEM((T * PB, E), jnp.float32),
                            pltpu.VMEM((T * PB, E), jnp.float32)],
        )(tokens, emb_table, slab)

    return forward


# --------------------------- pure-JAX reference -------------------------------
def textrcnn_reference(inputs, params):
    tokens, _ = inputs
    embed = params["embedding"][tokens].astype(jnp.float32)         # [B, T, E]
    B, T, E = embed.shape
    hp = lax.Precision.HIGHEST

    def lstm_dir(seq, wih, whh, bias):
        H = whh.shape[0]
        def step(carry, x_t):
            h, c = carry
            gates = (jnp.dot(x_t, wih, precision=hp)
                     + jnp.dot(h, whh, precision=hp) + bias)
            i = jax.nn.sigmoid(gates[:, 0:H])
            f = jax.nn.sigmoid(gates[:, H:2 * H])
            g = jnp.tanh(gates[:, 2 * H:3 * H])
            o = jax.nn.sigmoid(gates[:, 3 * H:4 * H])
            c = f * c + i * g
            h = o * jnp.tanh(c)
            return (h, c), h
        init = (jnp.zeros((B, H), jnp.float32), jnp.zeros((B, H), jnp.float32))
        _, hs = lax.scan(step, init, jnp.transpose(seq, (1, 0, 2)))
        return jnp.transpose(hs, (1, 0, 2))                          # [B, T, H]

    hf = lstm_dir(embed, params["wih_f"], params["whh_f"], params["b_f"])
    hb = lstm_dir(embed[:, ::-1], params["wih_b"], params["whh_b"], params["b_b"])[:, ::-1]
    out = jnp.concatenate([embed, hf, hb], axis=2)                   # cat((embed, lstm_out), 2)
    out = jax.nn.relu(out)
    pooled = jnp.max(out, axis=1)                                    # MaxPool1d(pad_size).squeeze()
    return jnp.dot(pooled, params["fc_w"], precision=hp) + params["fc_b"]


# --------------------------------- main ---------------------------------------
if __name__ == "__main__":
    n_vocab, E, H, T, C, B = 50, 32, 32, 8, 4, 2

    key = jax.random.PRNGKey(0)
    ks = jax.random.split(key, 12)
    s = 1.0 / np.sqrt(H)

    emb_table = 0.1 * jax.random.normal(ks[0], (n_vocab, E), jnp.float32)
    emb_table = emb_table.at[n_vocab - 1].set(0.0)                   # padding_idx row

    params = {
        "embedding": emb_table,
        # forward direction: W_ih^T [E,4H], W_hh^T [H,4H], combined bias (b_ih+b_hh) [1,4H]
        "wih_f": jax.random.uniform(ks[1], (E, 4 * H), jnp.float32, -s, s),
        "whh_f": jax.random.uniform(ks[2], (H, 4 * H), jnp.float32, -s, s),
        "b_f":   jax.random.uniform(ks[3], (1, 4 * H), jnp.float32, -s, s),
        # backward direction
        "wih_b": jax.random.uniform(ks[4], (E, 4 * H), jnp.float32, -s, s),
        "whh_b": jax.random.uniform(ks[5], (H, 4 * H), jnp.float32, -s, s),
        "b_b":   jax.random.uniform(ks[6], (1, 4 * H), jnp.float32, -s, s),
        # fc: weight^T [E+2H, C], bias [1, C]
        "fc_w":  jax.random.uniform(ks[7], (E + 2 * H, C), jnp.float32, -s, s),
        "fc_b":  jax.random.uniform(ks[8], (1, C), jnp.float32, -s, s),
    }

    tokens = jax.random.randint(ks[9], (B, T), 0, n_vocab, dtype=jnp.int32)
    seq_len = jnp.full((B,), T, jnp.int32)   # unused by the model (x, _ = x)

    slab = pack_params(params)               # one-time weight re-layout (glue)
    forward = build_forward(E, H, T, B, C)

    out = forward((tokens, seq_len), params["embedding"], slab)
    out = jax.block_until_ready(out)

    ref = jax.block_until_ready(textrcnn_reference((tokens, seq_len), params))
    # Kernel uses DEFAULT (single-pass bf16) MXU precision per perf review; reference
    # is computed at HIGHEST precision, so the tolerance is relaxed accordingly.
    np.testing.assert_allclose(np.asarray(out), np.asarray(ref), rtol=2e-2, atol=2e-2)

    print("KERNEL_OK")
</pallas_src>

<mosaic_0001>
module attributes {stable_mosaic.version = 11 : i64} {
  func.func @kernel(%arg0: memref<2x8xi32, #tpu.memory_space<smem>>, %arg1: memref<50x32xf32, #tpu.memory_space<vmem>>, %arg2: memref<240x256xf32, #tpu.memory_space<vmem>>, %arg3: memref<2x4xf32, #tpu.memory_space<vmem>>, %arg4: memref<64x32xf32, #tpu.memory_space<vmem>>, %arg5: memref<64x32xf32, #tpu.memory_space<vmem>>) attributes {dimension_semantics = [], scalar_prefetch = 0 : i64, scratch_operands = 2 : i64, tpu.core_type = #tpu.core_type<tc>} {
    %cst = arith.constant 0.000000e+00 : f32
    %0 = vector.broadcast %cst : f32 to vector<64x32xf32>
    %c0 = arith.constant 0 : index
    %c0_0 = arith.constant 0 : index
    %1 = vector.load %arg4[%c0, %c0_0] : memref<64x32xf32, #tpu.memory_space<vmem>>, vector<64x32xf32>
    tpu.vector_store %arg4[%c0, %c0_0], %0 {strides = array<i32>} : memref<64x32xf32, #tpu.memory_space<vmem>>, vector<64x32xf32>,
    %cst_1 = arith.constant 0.000000e+00 : f32
    %2 = vector.broadcast %cst_1 : f32 to vector<64x32xf32>
    %c0_2 = arith.constant 0 : index
    %c0_3 = arith.constant 0 : index
    %3 = vector.load %arg5[%c0_2, %c0_3] : memref<64x32xf32, #tpu.memory_space<vmem>>, vector<64x32xf32>
    tpu.vector_store %arg5[%c0_2, %c0_3], %2 {strides = array<i32>} : memref<64x32xf32, #tpu.memory_space<vmem>>, vector<64x32xf32>,
    %c0_4 = arith.constant 0 : index
    %c0_5 = arith.constant 0 : index
    %4 = memref.load %arg0[%c0_4, %c0_5] : memref<2x8xi32, #tpu.memory_space<smem>>
    %5 = arith.index_cast %4 : i32 to index
    %c0_6 = arith.constant 0 : index
    %6 = vector.load %arg1[%5, %c0_6] : memref<50x32xf32, #tpu.memory_space<vmem>>, vector<1x32xf32>
    %c0_7 = arith.constant 0 : index
    %c0_8 = arith.constant 0 : index
    %7 = vector.load %arg4[%c0_7, %c0_8] : memref<64x32xf32, #tpu.memory_space<vmem>>, vector<1x32xf32>
    tpu.vector_store %arg4[%c0_7, %c0_8], %6 {strides = array<i32>} : memref<64x32xf32, #tpu.memory_space<vmem>>, vector<1x32xf32>,
    %c56 = arith.constant 56 : index
    %c0_9 = arith.constant 0 : index
    %8 = vector.load %arg5[%c56, %c0_9] : memref<64x32xf32, #tpu.memory_space<vmem>>, vector<1x32xf32>
    tpu.vector_store %arg5[%c56, %c0_9], %6 {strides = array<i32>} : memref<64x32xf32, #tpu.memory_space<vmem>>, vector<1x32xf32>,
    %c1 = arith.constant 1 : index
    %c0_10 = arith.constant 0 : index
    %9 = memref.load %arg0[%c1, %c0_10] : memref<2x8xi32, #tpu.memory_space<smem>>
    %10 = arith.index_cast %9 : i32 to index
    %c0_11 = arith.constant 0 : index
    %11 = vector.load %arg1[%10, %c0_11] : memref<50x32xf32, #tpu.memory_space<vmem>>, vector<1x32xf32>
    %c1_12 = arith.constant 1 : index
    %c0_13 = arith.constant 0 : index
    %12 = vector.load %arg4[%c1_12, %c0_13] : memref<64x32xf32, #tpu.memory_space<vmem>>, vector<1x32xf32>
    tpu.vector_store %arg4[%c1_12, %c0_13], %11 {strides = array<i32>} : memref<64x32xf32, #tpu.memory_space<vmem>>, vector<1x32xf32>,
    %c57 = arith.constant 57 : index
    %c0_14 = arith.constant 0 : index
    %13 = vector.load %arg5[%c57, %c0_14] : memref<64x32xf32, #tpu.memory_space<vmem>>, vector<1x32xf32>
    tpu.vector_store %arg5[%c57, %c0_14], %11 {strides = array<i32>} : memref<64x32xf32, #tpu.memory_space<vmem>>, vector<1x32xf32>,
    %c0_15 = arith.constant 0 : index
    %c1_16 = arith.constant 1 : index
    %14 = memref.load %arg0[%c0_15, %c1_16] : memref<2x8xi32, #tpu.memory_space<smem>>
    %15 = arith.index_cast %14 : i32 to index
    %c0_17 = arith.constant 0 : index
    %16 = vector.load %arg1[%15, %c0_17] : memref<50x32xf32, #tpu.memory_space<vmem>>, vector<1x32xf32>
    %c8 = arith.constant 8 : index
    %c0_18 = arith.constant 0 : index
    %17 = vector.load %arg4[%c8, %c0_18] : memref<64x32xf32, #tpu.memory_space<vmem>>, vector<1x32xf32>
    tpu.vector_store %arg4[%c8, %c0_18], %16 {strides = array<i32>} : memref<64x32xf32, #tpu.memory_space<vmem>>, vector<1x32xf32>,
    %c48 = arith.constant 48 : index
    %c0_19 = arith.constant 0 : index
    %18 = vector.load %arg5[%c48, %c0_19] : memref<64x32xf32, #tpu.memory_space<vmem>>, vector<1x32xf32>
    tpu.vector_store %arg5[%c48, %c0_19], %16 {strides = array<i32>} : memref<64x32xf32, #tpu.memory_space<vmem>>, vector<1x32xf32>,
    %c1_20 = arith.constant 1 : index
    %c1_21 = arith.constant 1 : index
    %19 = memref.load %arg0[%c1_20, %c1_21] : memref<2x8xi32, #tpu.memory_space<smem>>
    %20 = arith.index_cast %19 : i32 to index
    %c0_22 = arith.constant 0 : index
    %21 = vector.load %arg1[%20, %c0_22] : memref<50x32xf32, #tpu.memory_space<vmem>>, vector<1x32xf32>
    %c9 = arith.constant 9 : index
    %c0_23 = arith.constant 0 : index
    %22 = vector.load %arg4[%c9, %c0_23] : memref<64x32xf32, #tpu.memory_space<vmem>>, vector<1x32xf32>
    tpu.vector_store %arg4[%c9, %c0_23], %21 {strides = array<i32>} : memref<64x32xf32, #tpu.memory_space<vmem>>, vector<1x32xf32>,
    %c49 = arith.constant 49 : index
    %c0_24 = arith.constant 0 : index
    %23 = vector.load %arg5[%c49, %c0_24] : memref<64x32xf32, #tpu.memory_space<vmem>>, vector<1x32xf32>
    tpu.vector_store %arg5[%c49, %c0_24], %21 {strides = array<i32>} : memref<64x32xf32, #tpu.memory_space<vmem>>, vector<1x32xf32>,
    %c0_25 = arith.constant 0 : index
    %c2 = arith.constant 2 : index
    %24 = memref.load %arg0[%c0_25, %c2] : memref<2x8xi32, #tpu.memory_space<smem>>
    %25 = arith.index_cast %24 : i32 to index
    %c0_26 = arith.constant 0 : index
    %26 = vector.load %arg1[%25, %c0_26] : memref<50x32xf32, #tpu.memory_space<vmem>>, vector<1x32xf32>
    %c16 = arith.constant 16 : index
    %c0_27 = arith.constant 0 : index
    %27 = vector.load %arg4[%c16, %c0_27] : memref<64x32xf32, #tpu.memory_space<vmem>>, vector<1x32xf32>
    tpu.vector_store %arg4[%c16, %c0_27], %26 {strides = array<i32>} : memref<64x32xf32, #tpu.memory_space<vmem>>, vector<1x32xf32>,
    %c40 = arith.constant 40 : index
    %c0_28 = arith.constant 0 : index
    %28 = vector.load %arg5[%c40, %c0_28] : memref<64x32xf32, #tpu.memory_space<vmem>>, vector<1x32xf32>
    tpu.vector_store %arg5[%c40, %c0_28], %26 {strides = array<i32>} : memref<64x32xf32, #tpu.memory_space<vmem>>, vector<1x32xf32>,
    %c1_29 = arith.constant 1 : index
    %c2_30 = arith.constant 2 : index
    %29 = memref.load %arg0[%c1_29, %c2_30] : memref<2x8xi32, #tpu.memory_space<smem>>
    %30 = arith.index_cast %29 : i32 to index
    %c0_31 = arith.constant 0 : index
    %31 = vector.load %arg1[%30, %c0_31] : memref<50x32xf32, #tpu.memory_space<vmem>>, vector<1x32xf32>
    %c17 = arith.constant 17 : index
    %c0_32 = arith.constant 0 : index
    %32 = vector.load %arg4[%c17, %c0_32] : memref<64x32xf32, #tpu.memory_space<vmem>>, vector<1x32xf32>
    tpu.vector_store %arg4[%c17, %c0_32], %31 {strides = array<i32>} : memref<64x32xf32, #tpu.memory_space<vmem>>, vector<1x32xf32>,
    %c41 = arith.constant 41 : index
    %c0_33 = arith.constant 0 : index
    %33 = vector.load %arg5[%c41, %c0_33] : memref<64x32xf32, #tpu.memory_space<vmem>>, vector<1x32xf32>
    tpu.vector_store %arg5[%c41, %c0_33], %31 {strides = array<i32>} : memref<64x32xf32, #tpu.memory_space<vmem>>, vector<1x32xf32>,
    %c0_34 = arith.constant 0 : index
    %c3 = arith.constant 3 : index
    %34 = memref.load %arg0[%c0_34, %c3] : memref<2x8xi32, #tpu.memory_space<smem>>
    %35 = arith.index_cast %34 : i32 to index
    %c0_35 = arith.constant 0 : index
    %36 = vector.load %arg1[%35, %c0_35] : memref<50x32xf32, #tpu.memory_space<vmem>>, vector<1x32xf32>
    %c24 = arith.constant 24 : index
    %c0_36 = arith.constant 0 : index
    %37 = vector.load %arg4[%c24, %c0_36] : memref<64x32xf32, #tpu.memory_space<vmem>>, vector<1x32xf32>
    tpu.vector_store %arg4[%c24, %c0_36], %36 {strides = array<i32>} : memref<64x32xf32, #tpu.memory_space<vmem>>, vector<1x32xf32>,
    %c32 = arith.constant 32 : index
    %c0_37 = arith.constant 0 : index
    %38 = vector.load %arg5[%c32, %c0_37] : memref<64x32xf32, #tpu.memory_space<vmem>>, vector<1x32xf32>
    tpu.vector_store %arg5[%c32, %c0_37], %36 {strides = array<i32>} : memref<64x32xf32, #tpu.memory_space<vmem>>, vector<1x32xf32>,
    %c1_38 = arith.constant 1 : index
    %c3_39 = arith.constant 3 : index
    %39 = memref.load %arg0[%c1_38, %c3_39] : memref<2x8xi32, #tpu.memory_space<smem>>
    %40 = arith.index_cast %39 : i32 to index
    %c0_40 = arith.constant 0 : index
    %41 = vector.load %arg1[%40, %c0_40] : memref<50x32xf32, #tpu.memory_space<vmem>>, vector<1x32xf32>
    %c25 = arith.constant 25 : index
    %c0_41 = arith.constant 0 : index
    %42 = vector.load %arg4[%c25, %c0_41] : memref<64x32xf32, #tpu.memory_space<vmem>>, vector<1x32xf32>
    tpu.vector_store %arg4[%c25, %c0_41], %41 {strides = array<i32>} : memref<64x32xf32, #tpu.memory_space<vmem>>, vector<1x32xf32>,
    %c33 = arith.constant 33 : index
    %c0_42 = arith.constant 0 : index
    %43 = vector.load %arg5[%c33, %c0_42] : memref<64x32xf32, #tpu.memory_space<vmem>>, vector<1x32xf32>
    tpu.vector_store %arg5[%c33, %c0_42], %41 {strides = array<i32>} : memref<64x32xf32, #tpu.memory_space<vmem>>, vector<1x32xf32>,
    %c0_43 = arith.constant 0 : index
    %c4 = arith.constant 4 : index
    %44 = memref.load %arg0[%c0_43, %c4] : memref<2x8xi32, #tpu.memory_space<smem>>
    %45 = arith.index_cast %44 : i32 to index
    %c0_44 = arith.constant 0 : index
    %46 = vector.load %arg1[%45, %c0_44] : memref<50x32xf32, #tpu.memory_space<vmem>>, vector<1x32xf32>
    %c32_45 = arith.constant 32 : index
    %c0_46 = arith.constant 0 : index
    %47 = vector.load %arg4[%c32_45, %c0_46] : memref<64x32xf32, #tpu.memory_space<vmem>>, vector<1x32xf32>
    tpu.vector_store %arg4[%c32_45, %c0_46], %46 {strides = array<i32>} : memref<64x32xf32, #tpu.memory_space<vmem>>, vector<1x32xf32>,
    %c24_47 = arith.constant 24 : index
    %c0_48 = arith.constant 0 : index
    %48 = vector.load %arg5[%c24_47, %c0_48] : memref<64x32xf32, #tpu.memory_space<vmem>>, vector<1x32xf32>
    tpu.vector_store %arg5[%c24_47, %c0_48], %46 {strides = array<i32>} : memref<64x32xf32, #tpu.memory_space<vmem>>, vector<1x32xf32>,
    %c1_49 = arith.constant 1 : index
    %c4_50 = arith.constant 4 : index
    %49 = memref.load %arg0[%c1_49, %c4_50] : memref<2x8xi32, #tpu.memory_space<smem>>
    %50 = arith.index_cast %49 : i32 to index
    %c0_51 = arith.constant 0 : index
    %51 = vector.load %arg1[%50, %c0_51] : memref<50x32xf32, #tpu.memory_space<vmem>>, vector<1x32xf32>
    %c33_52 = arith.constant 33 : index
    %c0_53 = arith.constant 0 : index
    %52 = vector.load %arg4[%c33_52, %c0_53] : memref<64x32xf32, #tpu.memory_space<vmem>>, vector<1x32xf32>
    tpu.vector_store %arg4[%c33_52, %c0_53], %51 {strides = array<i32>} : memref<64x32xf32, #tpu.memory_space<vmem>>, vector<1x32xf32>,
    %c25_54 = arith.constant 25 : index
    %c0_55 = arith.constant 0 : index
    %53 = vector.load %arg5[%c25_54, %c0_55] : memref<64x32xf32, #tpu.memory_space<vmem>>, vector<1x32xf32>
    tpu.vector_store %arg5[%c25_54, %c0_55], %51 {strides = array<i32>} : memref<64x32xf32, #tpu.memory_space<vmem>>, vector<1x32xf32>,
    %c0_56 = arith.constant 0 : index
    %c5 = arith.constant 5 : index
    %54 = memref.load %arg0[%c0_56, %c5] : memref<2x8xi32, #tpu.memory_space<smem>>
    %55 = arith.index_cast %54 : i32 to index
    %c0_57 = arith.constant 0 : index
    %56 = vector.load %arg1[%55, %c0_57] : memref<50x32xf32, #tpu.memory_space<vmem>>, vector<1x32xf32>
    %c40_58 = arith.constant 40 : index
    %c0_59 = arith.constant 0 : index
    %57 = vector.load %arg4[%c40_58, %c0_59] : memref<64x32xf32, #tpu.memory_space<vmem>>, vector<1x32xf32>
    tpu.vector_store %arg4[%c40_58, %c0_59], %56 {strides = array<i32>} : memref<64x32xf32, #tpu.memory_space<vmem>>, vector<1x32xf32>,
    %c16_60 = arith.constant 16 : index
    %c0_61 = arith.constant 0 : index
    %58 = vector.load %arg5[%c16_60, %c0_61] : memref<64x32xf32, #tpu.memory_space<vmem>>, vector<1x32xf32>
    tpu.vector_store %arg5[%c16_60, %c0_61], %56 {strides = array<i32>} : memref<64x32xf32, #tpu.memory_space<vmem>>, vector<1x32xf32>,
    %c1_62 = arith.constant 1 : index
    %c5_63 = arith.constant 5 : index
    %59 = memref.load %arg0[%c1_62, %c5_63] : memref<2x8xi32, #tpu.memory_space<smem>>
    %60 = arith.index_cast %59 : i32 to index
    %c0_64 = arith.constant 0 : index
    %61 = vector.load %arg1[%60, %c0_64] : memref<50x32xf32, #tpu.memory_space<vmem>>, vector<1x32xf32>
    %c41_65 = arith.constant 41 : index
    %c0_66 = arith.constant 0 : index
    %62 = vector.load %arg4[%c41_65, %c0_66] : memref<64x32xf32, #tpu.memory_space<vmem>>, vector<1x32xf32>
    tpu.vector_store %arg4[%c41_65, %c0_66], %61 {strides = array<i32>} : memref<64x32xf32, #tpu.memory_space<vmem>>, vector<1x32xf32>,
    %c17_67 = arith.constant 17 : index
    %c0_68 = arith.constant 0 : index
    %63 = vector.load %arg5[%c17_67, %c0_68] : memref<64x32xf32, #tpu.memory_space<vmem>>, vector<1x32xf32>
    tpu.vector_store %arg5[%c17_67, %c0_68], %61 {strides = array<i32>} : memref<64x32xf32, #tpu.memory_space<vmem>>, vector<1x32xf32>,
    %c0_69 = arith.constant 0 : index
    %c6 = arith.constant 6 : index
    %64 = memref.load %arg0[%c0_69, %c6] : memref<2x8xi32, #tpu.memory_space<smem>>
    %65 = arith.index_cast %64 : i32 to index
    %c0_70 = arith.constant 0 : index
    %66 = vector.load %arg1[%65, %c0_70] : memref<50x32xf32, #tpu.memory_space<vmem>>, vector<1x32xf32>
    %c48_71 = arith.constant 48 : index
    %c0_72 = arith.constant 0 : index
    %67 = vector.load %arg4[%c48_71, %c0_72] : memref<64x32xf32, #tpu.memory_space<vmem>>, vector<1x32xf32>
    tpu.vector_store %arg4[%c48_71, %c0_72], %66 {strides = array<i32>} : memref<64x32xf32, #tpu.memory_space<vmem>>, vector<1x32xf32>,
    %c8_73 = arith.constant 8 : index
    %c0_74 = arith.constant 0 : index
    %68 = vector.load %arg5[%c8_73, %c0_74] : memref<64x32xf32, #tpu.memory_space<vmem>>, vector<1x32xf32>
    tpu.vector_store %arg5[%c8_73, %c0_74], %66 {strides = array<i32>} : memref<64x32xf32, #tpu.memory_space<vmem>>, vector<1x32xf32>,
    %c1_75 = arith.constant 1 : index
    %c6_76 = arith.constant 6 : index
    %69 = memref.load %arg0[%c1_75, %c6_76] : memref<2x8xi32, #tpu.memory_space<smem>>
    %70 = arith.index_cast %69 : i32 to index
    %c0_77 = arith.constant 0 : index
    %71 = vector.load %arg1[%70, %c0_77] : memref<50x32xf32, #tpu.memory_space<vmem>>, vector<1x32xf32>
    %c49_78 = arith.constant 49 : index
    %c0_79 = arith.constant 0 : index
    %72 = vector.load %arg4[%c49_78, %c0_79] : memref<64x32xf32, #tpu.memory_space<vmem>>, vector<1x32xf32>
    tpu.vector_store %arg4[%c49_78, %c0_79], %71 {strides = array<i32>} : memref<64x32xf32, #tpu.memory_space<vmem>>, vector<1x32xf32>,
    %c9_80 = arith.constant 9 : index
    %c0_81 = arith.constant 0 : index
    %73 = vector.load %arg5[%c9_80, %c0_81] : memref<64x32xf32, #tpu.memory_space<vmem>>, vector<1x32xf32>
    tpu.vector_store %arg5[%c9_80, %c0_81], %71 {strides = array<i32>} : memref<64x32xf32, #tpu.memory_space<vmem>>, vector<1x32xf32>,
    %c0_82 = arith.constant 0 : index
    %c7 = arith.constant 7 : index
    %74 = memref.load %arg0[%c0_82, %c7] : memref<2x8xi32, #tpu.memory_space<smem>>
    %75 = arith.index_cast %74 : i32 to index
    %c0_83 = arith.constant 0 : index
    %76 = vector.load %arg1[%75, %c0_83] : memref<50x32xf32, #tpu.memory_space<vmem>>, vector<1x32xf32>
    %c56_84 = arith.constant 56 : index
    %c0_85 = arith.constant 0 : index
    %77 = vector.load %arg4[%c56_84, %c0_85] : memref<64x32xf32, #tpu.memory_space<vmem>>, vector<1x32xf32>
    tpu.vector_store %arg4[%c56_84, %c0_85], %76 {strides = array<i32>} : memref<64x32xf32, #tpu.memory_space<vmem>>, vector<1x32xf32>,
    %c0_86 = arith.constant 0 : index
    %c0_87 = arith.constant 0 : index
    %78 = vector.load %arg5[%c0_86, %c0_87] : memref<64x32xf32, #tpu.memory_space<vmem>>, vector<1x32xf32>
    tpu.vector_store %arg5[%c0_86, %c0_87], %76 {strides = array<i32>} : memref<64x32xf32, #tpu.memory_space<vmem>>, vector<1x32xf32>,
    %c1_88 = arith.constant 1 : index
    %c7_89 = arith.constant 7 : index
    %79 = memref.load %arg0[%c1_88, %c7_89] : memref<2x8xi32, #tpu.memory_space<smem>>
    %80 = arith.index_cast %79 : i32 to index
    %c0_90 = arith.constant 0 : index
    %81 = vector.load %arg1[%80, %c0_90] : memref<50x32xf32, #tpu.memory_space<vmem>>, vector<1x32xf32>
    %c57_91 = arith.constant 57 : index
    %c0_92 = arith.constant 0 : index
    %82 = vector.load %arg4[%c57_91, %c0_92] : memref<64x32xf32, #tpu.memory_space<vmem>>, vector<1x32xf32>
    tpu.vector_store %arg4[%c57_91, %c0_92], %81 {strides = array<i32>} : memref<64x32xf32, #tpu.memory_space<vmem>>, vector<1x32xf32>,
    %c1_93 = arith.constant 1 : index
    %c0_94 = arith.constant 0 : index
    %83 = vector.load %arg5[%c1_93, %c0_94] : memref<64x32xf32, #tpu.memory_space<vmem>>, vector<1x32xf32>
    tpu.vector_store %arg5[%c1_93, %c0_94], %81 {strides = array<i32>} : memref<64x32xf32, #tpu.memory_space<vmem>>, vector<1x32xf32>,
    %c0_95 = arith.constant 0 : index
    %c0_96 = arith.constant 0 : index
    %84 = vector.load %arg4[%c0_95, %c0_96] : memref<64x32xf32, #tpu.memory_space<vmem>>, vector<64x32xf32>
    %c0_97 = arith.constant 0 : index
    %c0_98 = arith.constant 0 : index
    %85 = vector.load %arg5[%c0_97, %c0_98] : memref<64x32xf32, #tpu.memory_space<vmem>>, vector<64x32xf32>
    %c0_99 = arith.constant 0 : index
    %c0_100 = arith.constant 0 : index
    %86 = vector.load %arg2[%c0_99, %c0_100] : memref<240x256xf32, #tpu.memory_space<vmem>>, vector<32x256xf32>
    %cst_101 = arith.constant dense<0.000000e+00> : vector<64x256xf32>
    %87 = tpu.matmul %84, %86, %cst_101 {dimension_numbers = #tpu.dot_dimension_numbers<[1], [0], [0], [1], [0, 0, 1, 1], [], []>} : vector<64x32xf32>, vector<32x256xf32>, vector<64x256xf32> -> vector<64x256xf32>
    %c32_102 = arith.constant 32 : index
    %c0_103 = arith.constant 0 : index
    %88 = vector.load %arg2[%c32_102, %c0_103] : memref<240x256xf32, #tpu.memory_space<vmem>>, vector<32x256xf32>
    %cst_104 = arith.constant dense<0.000000e+00> : vector<64x256xf32>
    %89 = tpu.matmul %85, %88, %cst_104 {dimension_numbers = #tpu.dot_dimension_numbers<[1], [0], [0], [1], [0, 0, 1, 1], [], []>} : vector<64x32xf32>, vector<32x256xf32>, vector<64x256xf32> -> vector<64x256xf32>
    %90 = arith.addf %87, %89 : vector<64x256xf32>
    %c128 = arith.constant 128 : index
    %c0_105 = arith.constant 0 : index
    %91 = vector.load %arg2[%c128, %c0_105] : memref<240x256xf32, #tpu.memory_space<vmem>>, vector<1x256xf32>
    %92 = vector.broadcast %91 : vector<1x256xf32> to vector<64x256xf32>
    %93 = arith.addf %90, %92 : vector<64x256xf32>
    %c64 = arith.constant 64 : index
    %c0_106 = arith.constant 0 : index
    %94 = vector.load %arg2[%c64, %c0_106] : memref<240x256xf32, #tpu.memory_space<vmem>>, vector<64x256xf32>
    %cst_107 = arith.constant 0.000000e+00 : f32
    %95 = vector.broadcast %cst_107 : f32 to vector<8x64xf32>
    %cst_108 = arith.constant 0.000000e+00 : f32
    %96 = vector.broadcast %cst_108 : f32 to vector<8x64xf32>
    %cst_109 = arith.constant 0.000000e+00 : f32
    %97 = vector.broadcast %cst_109 : f32 to vector<8x64xf32>
    %98 = vector.extract_strided_slice %93 {offsets = [0, 0], sizes = [8, 256], strides = [1, 1]} : vector<64x256xf32> to vector<8x256xf32>
    %cst_110 = arith.constant dense<0.000000e+00> : vector<8x256xf32>
    %99 = tpu.matmul %95, %94, %cst_110 {dimension_numbers = #tpu.dot_dimension_numbers<[1], [0], [0], [1], [0, 0, 1, 1], [], []>} : vector<8x64xf32>, vector<64x256xf32>, vector<8x256xf32> -> vector<8x256xf32>
    %100 = arith.addf %98, %99 : vector<8x256xf32>
    %101 = arith.negf %100 : vector<8x256xf32>
    %102 = math.exp %101 : vector<8x256xf32>
    %cst_111 = arith.constant 1.000000e+00 : f32
    %103 = vector.broadcast %cst_111 : f32 to vector<8x256xf32>
    %104 = arith.addf %103, %102 : vector<8x256xf32>
    %105 = arith.divf %103, %104 : vector<8x256xf32>
    %106 = vector.extract_strided_slice %105 {offsets = [0, 0], sizes = [8, 64], strides = [1, 1]} : vector<8x256xf32> to vector<8x64xf32>
    %107 = vector.extract_strided_slice %105 {offsets = [0, 64], sizes = [8, 64], strides = [1, 1]} : vector<8x256xf32> to vector<8x64xf32>
    %108 = vector.extract_strided_slice %105 {offsets = [0, 128], sizes = [8, 64], strides = [1, 1]} : vector<8x256xf32> to vector<8x64xf32>
    %109 = vector.extract_strided_slice %100 {offsets = [0, 192], sizes = [8, 64], strides = [1, 1]} : vector<8x256xf32> to vector<8x64xf32>
    %110 = math.tanh %109 : vector<8x64xf32>
    %111 = arith.mulf %107, %96 : vector<8x64xf32>
    %112 = arith.mulf %106, %110 : vector<8x64xf32>
    %113 = arith.addf %111, %112 : vector<8x64xf32>
    %114 = math.tanh %113 : vector<8x64xf32>
    %115 = arith.mulf %108, %114 : vector<8x64xf32>
    %116 = arith.maximumf %97, %115 : vector<8x64xf32>
    %117 = vector.extract_strided_slice %93 {offsets = [8, 0], sizes = [8, 256], strides = [1, 1]} : vector<64x256xf32> to vector<8x256xf32>
    %cst_112 = arith.constant dense<0.000000e+00> : vector<8x256xf32>
    %118 = tpu.matmul %115, %94, %cst_112 {dimension_numbers = #tpu.dot_dimension_numbers<[1], [0], [0], [1], [0, 0, 1, 1], [], []>} : vector<8x64xf32>, vector<64x256xf32>, vector<8x256xf32> -> vector<8x256xf32>
    %119 = arith.addf %117, %118 : vector<8x256xf32>
    %120 = arith.negf %119 : vector<8x256xf32>
    %121 = math.exp %120 : vector<8x256xf32>
    %cst_113 = arith.constant 1.000000e+00 : f32
    %122 = vector.broadcast %cst_113 : f32 to vector<8x256xf32>
    %123 = arith.addf %122, %121 : vector<8x256xf32>
    %124 = arith.divf %122, %123 : vector<8x256xf32>
    %125 = vector.extract_strided_slice %124 {offsets = [0, 0], sizes = [8, 64], strides = [1, 1]} : vector<8x256xf32> to vector<8x64xf32>
    %126 = vector.extract_strided_slice %124 {offsets = [0, 64], sizes = [8, 64], strides = [1, 1]} : vector<8x256xf32> to vector<8x64xf32>
    %127 = vector.extract_strided_slice %124 {offsets = [0, 128], sizes = [8, 64], strides = [1, 1]} : vector<8x256xf32> to vector<8x64xf32>
    %128 = vector.extract_strided_slice %119 {offsets = [0, 192], sizes = [8, 64], strides = [1, 1]} : vector<8x256xf32> to vector<8x64xf32>
    %129 = math.tanh %128 : vector<8x64xf32>
    %130 = arith.mulf %126, %113 : vector<8x64xf32>
    %131 = arith.mulf %125, %129 : vector<8x64xf32>
    %132 = arith.addf %130, %131 : vector<8x64xf32>
    %133 = math.tanh %132 : vector<8x64xf32>
    %134 = arith.mulf %127, %133 : vector<8x64xf32>
    %135 = arith.maximumf %116, %134 : vector<8x64xf32>
    %136 = vector.extract_strided_slice %93 {offsets = [16, 0], sizes = [8, 256], strides = [1, 1]} : vector<64x256xf32> to vector<8x256xf32>
    %cst_114 = arith.constant dense<0.000000e+00> : vector<8x256xf32>
    %137 = tpu.matmul %134, %94, %cst_114 {dimension_numbers = #tpu.dot_dimension_numbers<[1], [0], [0], [1], [0, 0, 1, 1], [], []>} : vector<8x64xf32>, vector<64x256xf32>, vector<8x256xf32> -> vector<8x256xf32>
    %138 = arith.addf %136, %137 : vector<8x256xf32>
    %139 = arith.negf %138 : vector<8x256xf32>
    %140 = math.exp %139 : vector<8x256xf32>
    %cst_115 = arith.constant 1.000000e+00 : f32
    %141 = vector.broadcast %cst_115 : f32 to vector<8x256xf32>
    %142 = arith.addf %141, %140 : vector<8x256xf32>
    %143 = arith.divf %141, %142 : vector<8x256xf32>
    %144 = vector.extract_strided_slice %143 {offsets = [0, 0], sizes = [8, 64], strides = [1, 1]} : vector<8x256xf32> to vector<8x64xf32>
    %145 = vector.extract_strided_slice %143 {offsets = [0, 64], sizes = [8, 64], strides = [1, 1]} : vector<8x256xf32> to vector<8x64xf32>
    %146 = vector.extract_strided_slice %143 {offsets = [0, 128], sizes = [8, 64], strides = [1, 1]} : vector<8x256xf32> to vector<8x64xf32>
    %147 = vector.extract_strided_slice %138 {offsets = [0, 192], sizes = [8, 64], strides = [1, 1]} : vector<8x256xf32> to vector<8x64xf32>
    %148 = math.tanh %147 : vector<8x64xf32>
    %149 = arith.mulf %145, %132 : vector<8x64xf32>
    %150 = arith.mulf %144, %148 : vector<8x64xf32>
    %151 = arith.addf %149, %150 : vector<8x64xf32>
    %152 = math.tanh %151 : vector<8x64xf32>
    %153 = arith.mulf %146, %152 : vector<8x64xf32>
    %154 = arith.maximumf %135, %153 : vector<8x64xf32>
    %155 = vector.extract_strided_slice %93 {offsets = [24, 0], sizes = [8, 256], strides = [1, 1]} : vector<64x256xf32> to vector<8x256xf32>
    %cst_116 = arith.constant dense<0.000000e+00> : vector<8x256xf32>
    %156 = tpu.matmul %153, %94, %cst_116 {dimension_numbers = #tpu.dot_dimension_numbers<[1], [0], [0], [1], [0, 0, 1, 1], [], []>} : vector<8x64xf32>, vector<64x256xf32>, vector<8x256xf32> -> vector<8x256xf32>
    %157 = arith.addf %155, %156 : vector<8x256xf32>
    %158 = arith.negf %157 : vector<8x256xf32>
    %159 = math.exp %158 : vector<8x256xf32>
    %cst_117 = arith.constant 1.000000e+00 : f32
    %160 = vector.broadcast %cst_117 : f32 to vector<8x256xf32>
    %161 = arith.addf %160, %159 : vector<8x256xf32>
    %162 = arith.divf %160, %161 : vector<8x256xf32>
    %163 = vector.extract_strided_slice %162 {offsets = [0, 0], sizes = [8, 64], strides = [1, 1]} : vector<8x256xf32> to vector<8x64xf32>
    %164 = vector.extract_strided_slice %162 {offsets = [0, 64], sizes = [8, 64], strides = [1, 1]} : vector<8x256xf32> to vector<8x64xf32>
    %165 = vector.extract_strided_slice %162 {offsets = [0, 128], sizes = [8, 64], strides = [1, 1]} : vector<8x256xf32> to vector<8x64xf32>
    %166 = vector.extract_strided_slice %157 {offsets = [0, 192], sizes = [8, 64], strides = [1, 1]} : vector<8x256xf32> to vector<8x64xf32>
    %167 = math.tanh %166 : vector<8x64xf32>
    %168 = arith.mulf %164, %151 : vector<8x64xf32>
    %169 = arith.mulf %163, %167 : vector<8x64xf32>
    %170 = arith.addf %168, %169 : vector<8x64xf32>
    %171 = math.tanh %170 : vector<8x64xf32>
    %172 = arith.mulf %165, %171 : vector<8x64xf32>
    %173 = arith.maximumf %154, %172 : vector<8x64xf32>
    %174 = vector.extract_strided_slice %93 {offsets = [32, 0], sizes = [8, 256], strides = [1, 1]} : vector<64x256xf32> to vector<8x256xf32>
    %cst_118 = arith.constant dense<0.000000e+00> : vector<8x256xf32>
    %175 = tpu.matmul %172, %94, %cst_118 {dimension_numbers = #tpu.dot_dimension_numbers<[1], [0], [0], [1], [0, 0, 1, 1], [], []>} : vector<8x64xf32>, vector<64x256xf32>, vector<8x256xf32> -> vector<8x256xf32>
    %176 = arith.addf %174, %175 : vector<8x256xf32>
    %177 = arith.negf %176 : vector<8x256xf32>
    %178 = math.exp %177 : vector<8x256xf32>
    %cst_119 = arith.constant 1.000000e+00 : f32
    %179 = vector.broadcast %cst_119 : f32 to vector<8x256xf32>
    %180 = arith.addf %179, %178 : vector<8x256xf32>
    %181 = arith.divf %179, %180 : vector<8x256xf32>
    %182 = vector.extract_strided_slice %181 {offsets = [0, 0], sizes = [8, 64], strides = [1, 1]} : vector<8x256xf32> to vector<8x64xf32>
    %183 = vector.extract_strided_slice %181 {offsets = [0, 64], sizes = [8, 64], strides = [1, 1]} : vector<8x256xf32> to vector<8x64xf32>
    %184 = vector.extract_strided_slice %181 {offsets = [0, 128], sizes = [8, 64], strides = [1, 1]} : vector<8x256xf32> to vector<8x64xf32>
    %185 = vector.extract_strided_slice %176 {offsets = [0, 192], sizes = [8, 64], strides = [1, 1]} : vector<8x256xf32> to vector<8x64xf32>
    %186 = math.tanh %185 : vector<8x64xf32>
    %187 = arith.mulf %183, %170 : vector<8x64xf32>
    %188 = arith.mulf %182, %186 : vector<8x64xf32>
    %189 = arith.addf %187, %188 : vector<8x64xf32>
    %190 = math.tanh %189 : vector<8x64xf32>
    %191 = arith.mulf %184, %190 : vector<8x64xf32>
    %192 = arith.maximumf %173, %191 : vector<8x64xf32>
    %193 = vector.extract_strided_slice %93 {offsets = [40, 0], sizes = [8, 256], strides = [1, 1]} : vector<64x256xf32> to vector<8x256xf32>
    %cst_120 = arith.constant dense<0.000000e+00> : vector<8x256xf32>
    %194 = tpu.matmul %191, %94, %cst_120 {dimension_numbers = #tpu.dot_dimension_numbers<[1], [0], [0], [1], [0, 0, 1, 1], [], []>} : vector<8x64xf32>, vector<64x256xf32>, vector<8x256xf32> -> vector<8x256xf32>
    %195 = arith.addf %193, %194 : vector<8x256xf32>
    %196 = arith.negf %195 : vector<8x256xf32>
    %197 = math.exp %196 : vector<8x256xf32>
    %cst_121 = arith.constant 1.000000e+00 : f32
    %198 = vector.broadcast %cst_121 : f32 to vector<8x256xf32>
    %199 = arith.addf %198, %197 : vector<8x256xf32>
    %200 = arith.divf %198, %199 : vector<8x256xf32>
    %201 = vector.extract_strided_slice %200 {offsets = [0, 0], sizes = [8, 64], strides = [1, 1]} : vector<8x256xf32> to vector<8x64xf32>
    %202 = vector.extract_strided_slice %200 {offsets = [0, 64], sizes = [8, 64], strides = [1, 1]} : vector<8x256xf32> to vector<8x64xf32>
    %203 = vector.extract_strided_slice %200 {offsets = [0, 128], sizes = [8, 64], strides = [1, 1]} : vector<8x256xf32> to vector<8x64xf32>
    %204 = vector.extract_strided_slice %195 {offsets = [0, 192], sizes = [8, 64], strides = [1, 1]} : vector<8x256xf32> to vector<8x64xf32>
    %205 = math.tanh %204 : vector<8x64xf32>
    %206 = arith.mulf %202, %189 : vector<8x64xf32>
    %207 = arith.mulf %201, %205 : vector<8x64xf32>
    %208 = arith.addf %206, %207 : vector<8x64xf32>
    %209 = math.tanh %208 : vector<8x64xf32>
    %210 = arith.mulf %203, %209 : vector<8x64xf32>
    %211 = arith.maximumf %192, %210 : vector<8x64xf32>
    %212 = vector.extract_strided_slice %93 {offsets = [48, 0], sizes = [8, 256], strides = [1, 1]} : vector<64x256xf32> to vector<8x256xf32>
    %cst_122 = arith.constant dense<0.000000e+00> : vector<8x256xf32>
    %213 = tpu.matmul %210, %94, %cst_122 {dimension_numbers = #tpu.dot_dimension_numbers<[1], [0], [0], [1], [0, 0, 1, 1], [], []>} : vector<8x64xf32>, vector<64x256xf32>, vector<8x256xf32> -> vector<8x256xf32>
    %214 = arith.addf %212, %213 : vector<8x256xf32>
    %215 = arith.negf %214 : vector<8x256xf32>
    %216 = math.exp %215 : vector<8x256xf32>
    %cst_123 = arith.constant 1.000000e+00 : f32
    %217 = vector.broadcast %cst_123 : f32 to vector<8x256xf32>
    %218 = arith.addf %217, %216 : vector<8x256xf32>
    %219 = arith.divf %217, %218 : vector<8x256xf32>
    %220 = vector.extract_strided_slice %219 {offsets = [0, 0], sizes = [8, 64], strides = [1, 1]} : vector<8x256xf32> to vector<8x64xf32>
    %221 = vector.extract_strided_slice %219 {offsets = [0, 64], sizes = [8, 64], strides = [1, 1]} : vector<8x256xf32> to vector<8x64xf32>
    %222 = vector.extract_strided_slice %219 {offsets = [0, 128], sizes = [8, 64], strides = [1, 1]} : vector<8x256xf32> to vector<8x64xf32>
    %223 = vector.extract_strided_slice %214 {offsets = [0, 192], sizes = [8, 64], strides = [1, 1]} : vector<8x256xf32> to vector<8x64xf32>
    %224 = math.tanh %223 : vector<8x64xf32>
    %225 = arith.mulf %221, %208 : vector<8x64xf32>
    %226 = arith.mulf %220, %224 : vector<8x64xf32>
    %227 = arith.addf %225, %226 : vector<8x64xf32>
    %228 = math.tanh %227 : vector<8x64xf32>
    %229 = arith.mulf %222, %228 : vector<8x64xf32>
    %230 = arith.maximumf %211, %229 : vector<8x64xf32>
    %231 = vector.extract_strided_slice %93 {offsets = [56, 0], sizes = [8, 256], strides = [1, 1]} : vector<64x256xf32> to vector<8x256xf32>
    %cst_124 = arith.constant dense<0.000000e+00> : vector<8x256xf32>
    %232 = tpu.matmul %229, %94, %cst_124 {dimension_numbers = #tpu.dot_dimension_numbers<[1], [0], [0], [1], [0, 0, 1, 1], [], []>} : vector<8x64xf32>, vector<64x256xf32>, vector<8x256xf32> -> vector<8x256xf32>
    %233 = arith.addf %231, %232 : vector<8x256xf32>
    %234 = arith.negf %233 : vector<8x256xf32>
    %235 = math.exp %234 : vector<8x256xf32>
    %cst_125 = arith.constant 1.000000e+00 : f32
    %236 = vector.broadcast %cst_125 : f32 to vector<8x256xf32>
    %237 = arith.addf %236, %235 : vector<8x256xf32>
    %238 = arith.divf %236, %237 : vector<8x256xf32>
    %239 = vector.extract_strided_slice %238 {offsets = [0, 0], sizes = [8, 64], strides = [1, 1]} : vector<8x256xf32> to vector<8x64xf32>
    %240 = vector.extract_strided_slice %238 {offsets = [0, 64], sizes = [8, 64], strides = [1, 1]} : vector<8x256xf32> to vector<8x64xf32>
    %241 = vector.extract_strided_slice %238 {offsets = [0, 128], sizes = [8, 64], strides = [1, 1]} : vector<8x256xf32> to vector<8x64xf32>
    %242 = vector.extract_strided_slice %233 {offsets = [0, 192], sizes = [8, 64], strides = [1, 1]} : vector<8x256xf32> to vector<8x64xf32>
    %243 = math.tanh %242 : vector<8x64xf32>
    %244 = arith.mulf %240, %227 : vector<8x64xf32>
    %245 = arith.mulf %239, %243 : vector<8x64xf32>
    %246 = arith.addf %244, %245 : vector<8x64xf32>
    %247 = math.tanh %246 : vector<8x64xf32>
    %248 = arith.mulf %241, %247 : vector<8x64xf32>
    %249 = arith.maximumf %230, %248 : vector<8x64xf32>
    %250 = vector.extract_strided_slice %84 {offsets = [0, 0], sizes = [8, 32], strides = [1, 1]} : vector<64x32xf32> to vector<8x32xf32>
    %251 = vector.extract_strided_slice %84 {offsets = [8, 0], sizes = [8, 32], strides = [1, 1]} : vector<64x32xf32> to vector<8x32xf32>
    %252 = arith.maximumf %250, %251 : vector<8x32xf32>
    %253 = vector.extract_strided_slice %84 {offsets = [16, 0], sizes = [8, 32], strides = [1, 1]} : vector<64x32xf32> to vector<8x32xf32>
    %254 = arith.maximumf %252, %253 : vector<8x32xf32>
    %255 = vector.extract_strided_slice %84 {offsets = [24, 0], sizes = [8, 32], strides = [1, 1]} : vector<64x32xf32> to vector<8x32xf32>
    %256 = arith.maximumf %254, %255 : vector<8x32xf32>
    %257 = vector.extract_strided_slice %84 {offsets = [32, 0], sizes = [8, 32], strides = [1, 1]} : vector<64x32xf32> to vector<8x32xf32>
    %258 = arith.maximumf %256, %257 : vector<8x32xf32>
    %259 = vector.extract_strided_slice %84 {offsets = [40, 0], sizes = [8, 32], strides = [1, 1]} : vector<64x32xf32> to vector<8x32xf32>
    %260 = arith.maximumf %258, %259 : vector<8x32xf32>
    %261 = vector.extract_strided_slice %84 {offsets = [48, 0], sizes = [8, 32], strides = [1, 1]} : vector<64x32xf32> to vector<8x32xf32>
    %262 = arith.maximumf %260, %261 : vector<8x32xf32>
    %263 = vector.extract_strided_slice %84 {offsets = [56, 0], sizes = [8, 32], strides = [1, 1]} : vector<64x32xf32> to vector<8x32xf32>
    %264 = arith.maximumf %262, %263 : vector<8x32xf32>
    %cst_126 = arith.constant 0.000000e+00 : f32
    %265 = vector.broadcast %cst_126 : f32 to vector<8x32xf32>
    %266 = arith.maximumf %264, %265 : vector<8x32xf32>
    %c136 = arith.constant 136 : index
    %c0_127 = arith.constant 0 : index
    %267 = vector.load %arg2[%c136, %c0_127] : memref<240x256xf32, #tpu.memory_space<vmem>>, vector<32x256xf32>
    %cst_128 = arith.constant dense<0.000000e+00> : vector<8x256xf32>
    %268 = tpu.matmul %266, %267, %cst_128 {dimension_numbers = #tpu.dot_dimension_numbers<[1], [0], [0], [1], [0, 0, 1, 1], [], []>} : vector<8x32xf32>, vector<32x256xf32>, vector<8x256xf32> -> vector<8x256xf32>
    %c168 = arith.constant 168 : index
    %c0_129 = arith.constant 0 : index
    %269 = vector.load %arg2[%c168, %c0_129] : memref<240x256xf32, #tpu.memory_space<vmem>>, vector<64x256xf32>
    %cst_130 = arith.constant dense<0.000000e+00> : vector<8x256xf32>
    %270 = tpu.matmul %249, %269, %cst_130 {dimension_numbers = #tpu.dot_dimension_numbers<[1], [0], [0], [1], [0, 0, 1, 1], [], []>} : vector<8x64xf32>, vector<64x256xf32>, vector<8x256xf32> -> vector<8x256xf32>
    %271 = arith.addf %268, %270 : vector<8x256xf32>
    %c232 = arith.constant 232 : index
    %c0_131 = arith.constant 0 : index
    %272 = vector.load %arg2[%c232, %c0_131] : memref<240x256xf32, #tpu.memory_space<vmem>>, vector<1x256xf32>
    %273 = vector.broadcast %272 : vector<1x256xf32> to vector<8x256xf32>
    %274 = arith.addf %271, %273 : vector<8x256xf32>
    %275 = vector.extract_strided_slice %274 {offsets = [0, 0], sizes = [2, 4], strides = [1, 1]} : vector<8x256xf32> to vector<2x4xf32>
    %c0_132 = arith.constant 0 : index
    %c0_133 = arith.constant 0 : index
    %276 = vector.load %arg3[%c0_132, %c0_133] : memref<2x4xf32, #tpu.memory_space<vmem>>, vector<2x4xf32>
    tpu.vector_store %arg3[%c0_132, %c0_133], %275 {strides = array<i32>} : memref<2x4xf32, #tpu.memory_space<vmem>>, vector<2x4xf32>,
    return
  }
}

</mosaic_0001>

<bundles_post_ra>
// kernel: forward.1
= control target key start
LH: loop header
LB: loop body
LE: loop exit
PB: predicated region body
PF: predicated region fallthrough
CT: control target
= control target key end

     0   :  { %8 = vsyncpa [#allocation7], 0  ;;  %s2184_s0 = inlined_call_operand.vmem [shape: s32[2,8], index: 0, kind: input, shape index: {}]   ;;  %s2185_s1 = inlined_call_operand.vmem [shape: f32[50,32], index: 1, kind: input, shape index: {}]   ;;  %s2186_s2 = inlined_call_operand.hbm [shape: f32[240,256], index: 2, kind: input, shape index: {}]   ;;  %s2187_s3 = inlined_call_operand.hbm [shape: f32[2,4], index: 3, kind: output, shape index: {}]  }
   0x1   :  { %9 = vsyncpa [#allocation5], 0 }
   0x2   :  { %10 = vsyncpa [#allocation6], 0  ;;  %s16_s14 = sshll.u32 %s2184_s0, 4  ;;  %s26_s17 = sshll.u32 %s2186_s2, 4  ;;  %s17_s14 = int_to_ptr.vmem [resolvable:$true] %s16_s14  ;;  %s27_s17 = int_to_ptr.hbm [resolvable:$true] %s26_s17 }
   0x3   :  { %s1605_s18 = smov [#allocation4]   ;;  %s1606_s19 = smov [#allocation8]  }
   0x4   :  { %19 = dma.vmem_to_smem %s17_s14, 32, %s1605_s18, [#allocation7]  }
   0x5   :  { %s28_s20 = sshll.u32 %s1606_s19, 4  ;;  %s1607_s21 = smov 256   ;;  %s29_s20 = int_to_ptr.vmem [resolvable:$true] %s28_s20 }
   0x6   :  { %s1608_s22 = smov 16  }
   0x7   :  { %34 = dma.hbm_to_vmem [thread:$0]  %s27_s17, 7680, %s29_s20, [#allocation5], %s1607_s21, %s1607_s21, %s1608_s22  }
   0x8   :  { %1599 = dma.done.wait [#allocation7], 32  }
   0x9   :  { %1600 = vsyncadd [#allocation7], 4294967264 }
   0xa   :  { %1601 = dma.done.wait [#allocation5], 7680  }
   0xb   :  { %1602 = vsyncadd [#allocation5], 4294959616 }
   0xc   :  { %43 = sfence }
   0xd   :  { %v173_v0 = vld [vmem:[#allocation8 + $0x78] sm:$0xff]  ;;  %v171_v2 = vld [vmem:[#allocation8 + $0x68] sm:$0xff]  ;;  %vm44_vm0 = vcmask 261120   ;;  %v1609_v4 = vmov 0.0   ;;  %s1363_s0 = sld [smem:[#allocation4 + $0x7]]  ;;  %vm64_vm1 = vcmask 253952  }
   0xe   :  { %v165_v1 = vld [vmem:[#allocation8 + $0x38] sm:$0xff]  ;;  %251 = vmatpush.msra.mxu1 %v173_v0  ;;  %v163_v3 = vld [vmem:[#allocation8 + $0x28] sm:$0xff]  ;;  %53 = vst.msk [vmem:[#allocation3] sm:$0xff] %vm44_vm0, %v1609_v4  ;;  %s1364_s2 = sld [smem:[#allocation4 + $0x87]]  ;;  %v172_v19 = vld [vmem:[#allocation8 + $0x70] sm:$0xff]  ;;  %vm425_vm10 = vcmask 523264  }
   0xf   :  { %357 = vmatpush.msra.mxu3 %v165_v1  ;;  %v169_v5 = vld [vmem:[#allocation8 + $0x58] sm:$0xff]  ;;  %45 = vst.msk [vmem:[#allocation2] sm:$0xff] %vm44_vm0, %v1609_v4  ;;  %v167_v7 = vld [vmem:[#allocation8 + $0x48] sm:$0xff]  ;;  %s1648_s23 = sld [smem:[#allocation4]]  ;;  %210 = vmatpush.msra.mxu0 %v172_v19  ;;  %v170_v21 = vld [vmem:[#allocation8 + $0x60] sm:$0xff] }
  0x10   :  { %v161_v6 = vld [vmem:[#allocation8 + $0x18] sm:$0xff]  ;;  %252 = vmatpush.msra.mxu1 %v171_v2  ;;  %46 = vst.msk [vmem:[#allocation2 + $0x8] sm:$0xff] %vm44_vm0, %v1609_v4  ;;  %v159_v8 = vld [vmem:[#allocation8 + $0x8] sm:$0xff]  ;;  %s1654_s24 = sld [smem:[#allocation4 + $0x80]]  ;;  %1429 = vmatpush.msra.mxu2 %v172_v19  ;;  %v168_v27 = vld [vmem:[#allocation8 + $0x50] sm:$0xff] }
  0x11   :  { %358 = vmatpush.msra.mxu3 %v163_v3  ;;  %47 = vst.msk [vmem:[#allocation2 + $0x10] sm:$0xff] %vm44_vm0, %v1609_v4  ;;  %v1650_v9 = vld [vmem:[#allocation8 + $0xf8] sm:$0xff]  ;;  %v1661_v10 = vld [vmem:[#allocation8 + $0xe8] sm:$0xff]  ;;  %s1676_s4 = sld [smem:[#allocation4 + $0x6]]  ;;  %211 = vmatpush.msra.mxu0 %v170_v21  ;;  %v166_v28 = vld [vmem:[#allocation8 + $0x40] sm:$0xff] }
  0x12   :  { %253 = vmatpush.msra.mxu1 %v169_v5  ;;  %48 = vst.msk [vmem:[#allocation2 + $0x18] sm:$0xff] %vm44_vm0, %v1609_v4  ;;  %s1680_s5 = sld [smem:[#allocation4 + $0x86]]  ;;  %v1694_v13 = vld [vmem:[#allocation8 + $0xd8] sm:$0xff]  ;;  %v1732_v18 = vld [vmem:[#allocation8 + $0xc8] sm:$0xff]  ;;  %1430 = vmatpush.msra.mxu2 %v170_v21  ;;  %v164_v54 = vld [vmem:[#allocation8 + $0x30] sm:$0xff] }
  0x13   :  { %359 = vmatpush.msra.mxu3 %v161_v6  ;;  %49 = vst.msk [vmem:[#allocation2 + $0x20] sm:$0xff] %vm44_vm0, %v1609_v4  ;;  %s133_s27 = scalar_lea.vmem %s2185_s1, %s1363_s0  ;;  %s1698_s12 = sld [smem:[#allocation4 + $0x1]]  ;;  %v1770_v26 = vld [vmem:[#allocation8 + $0xb8] sm:$0xff]  ;;  %212 = vmatpush.msra.mxu0 %v168_v27  ;;  %v1811_v36 = vld [vmem:[#allocation8 + $0xa8] sm:$0xff]  ;;  %v162_v55 = vld [vmem:[#allocation8 + $0x20] sm:$0xff] }
  0x14   :  { %254 = vmatpush.msra.mxu1 %v167_v7  ;;  %50 = vst.msk [vmem:[#allocation2 + $0x28] sm:$0xff] %vm44_vm0, %v1609_v4  ;;  %v134_v11 = vld [vmem:[%s133_s27] sm:$0x1]  ;;  %s138_s30 = scalar_lea.vmem %s2185_s1, %s1364_s2  ;;  %s1704_s13 = sld [smem:[#allocation4 + $0x81]]  ;;  %1431 = vmatpush.msra.mxu2 %v168_v27  ;;  %v1838_v43 = vld [vmem:[#allocation8 + $0x98] sm:$0xff]  ;;  %v1855_v48 = vld [vmem:[#allocation8 + $0x88] sm:$0xff] }
  0x15   :  { %360 = vmatpush.msra.mxu3 %v159_v8  ;;  %51 = vst.msk [vmem:[#allocation2 + $0x30] sm:$0xff] %vm44_vm0, %v1609_v4  ;;  %v139_v12 = vld [vmem:[%s138_s30] sm:$0x1]  ;;  %s62_s8 = scalar_lea.vmem %s2185_s1, %s1648_s23  ;;  %s1714_s14 = sld [smem:[#allocation4 + $0x5]]  ;;  %213 = vmatpush.msra.mxu0 %v166_v28  ;;  %v1869_v56 = vld [vmem:[#allocation8 + $0xf0] sm:$0xff] }
  0x16   :  { %457 = vmatpush.msrb.mxu1 %v1650_v9  ;;  %136 = vst.msk [vmem:[#allocation3] sm:$0x1] %vm64_vm1, %v134_v11  ;;  %s68_s11 = scalar_lea.vmem %s2185_s1, %s1654_s24  ;;  %v63_v14 = vld [vmem:[%s62_s8] sm:$0x1]  ;;  %s1726_s21 = sld [smem:[#allocation4 + $0x85]]  ;;  %1432 = vmatpush.msra.mxu2 %v166_v28  ;;  %v160_v60 = vld [vmem:[#allocation8 + $0x10] sm:$0xff] }
  0x17   :  { %559 = vmatpush.msrb.mxu3 %v1650_v9  ;;  %141 = vst.msk [vmem:[#allocation3 + $0x1] sm:$0x1] %vm64_vm1, %v139_v12  ;;  %v69_v16 = vld [vmem:[%s68_s11] sm:$0x1]  ;;  %s123_s17 = scalar_lea.vmem %s2185_s1, %s1676_s4  ;;  %s1729_s22 = sld [smem:[#allocation4 + $0x2]]  ;;  %437 = vmatpush.msrb.mxu0 %v1869_v56  ;;  %v1879_v61 = vld [vmem:[#allocation8 + $0xd0] sm:$0xff] }
  0x18   :  { %458 = vmatpush.msrb.mxu1 %v1661_v10  ;;  %52 = vst.msk [vmem:[#allocation2 + $0x38] sm:$0xff] %vm44_vm0, %v1609_v4  ;;  %s128_s20 = scalar_lea.vmem %s2185_s1, %s1680_s5  ;;  %v124_v17 = vld [vmem:[%s123_s17] sm:$0x1]  ;;  %s1745_s27 = sld [smem:[#allocation4 + $0x82]]  ;;  %316 = vmatpush.msrb.mxu2 %v164_v54  ;;  %v1894_v3 = vld [vmem:[#allocation8 + $0xb0] sm:$0xff] }
  0x19   :  { %560 = vmatpush.msrb.mxu3 %v1661_v10  ;;  %54 = vst.msk [vmem:[#allocation3 + $0x8] sm:$0xff] %vm44_vm0, %v1609_v4  ;;  %v129_v20 = vld [vmem:[%s128_s20] sm:$0x1]  ;;  %s73_s23 = scalar_lea.vmem %s2185_s1, %s1698_s12  ;;  %s1754_s4 = sld [smem:[#allocation4 + $0x4]]  ;;  %v1906_v6 = vld [vmem:[#allocation8 + $0x90] sm:$0xff] }
  0x1a   :  { %55 = vst.msk [vmem:[#allocation3 + $0x10] sm:$0xff] %vm44_vm0, %v1609_v4  ;;  %459 = vmatpush.msrb.mxu1 %v1694_v13  ;;  %s78_s26 = scalar_lea.vmem %s2185_s1, %s1704_s13  ;;  %v74_v22 = vld [vmem:[%s73_s23] sm:$0x1]  ;;  %s1766_s8 = sld [smem:[#allocation4 + $0x84]]  ;;  %317 = vmatpush.msrb.mxu2 %v162_v55 }
  0x1b   :  { %56 = vst.msk [vmem:[#allocation3 + $0x18] sm:$0xff] %vm44_vm0, %v1609_v4  ;;  %561 = vmatpush.msrb.mxu3 %v1694_v13  ;;  %s113_s30 = scalar_lea.vmem %s2185_s1, %s1714_s14  ;;  %v79_v24 = vld [vmem:[%s78_s26] sm:$0x1]  ;;  %s1777_s12 = sld [smem:[#allocation4 + $0x3]] }
  0x1c   :  { %57 = vst.msk [vmem:[#allocation3 + $0x20] sm:$0xff] %vm44_vm0, %v1609_v4  ;;  %460 = vmatpush.msrb.mxu1 %v1732_v18  ;;  %s118_s7 = scalar_lea.vmem %s2185_s1, %s1726_s21  ;;  %v114_v25 = vld [vmem:[%s113_s30] sm:$0x1]  ;;  %s1785_s16 = sld [smem:[#allocation4 + $0x83]]  ;;  %318 = vmatpush.msrb.mxu2 %v160_v60 }
  0x1d   :  { %58 = vst.msk [vmem:[#allocation3 + $0x28] sm:$0xff] %vm44_vm0, %v1609_v4  ;;  %562 = vmatpush.msrb.mxu3 %v1732_v18  ;;  %v119_v29 = vld [vmem:[%s118_s7] sm:$0x1]  ;;  %s83_s11 = scalar_lea.vmem %s2185_s1, %s1729_s22 }
  0x1e   :  { %v1706_v15 = vld [vmem:[#allocation3] sm:$0xff]  ;;  %59 = vst.msk [vmem:[#allocation3 + $0x30] sm:$0xff] %vm44_vm0, %v1609_v4  ;;  %461 = vmatpush.msrb.mxu1 %v1770_v26  ;;  %s88_s15 = scalar_lea.vmem %s2185_s1, %s1745_s27  ;;  %s1611_s27 = smov [#allocation9]  }
  0x1f   :  { %1373 = vmatmul.msk.f32.vlgmr.msra.gmra.mxu1 %vm44_vm0, %v1706_v15  ;;  %60 = vst.msk [vmem:[#allocation3 + $0x38] sm:$0xff] %vm44_vm0, %v1609_v4  ;;  %563 = vmatpush.msrb.mxu3 %v1770_v26  ;;  %v84_v31 = vld [vmem:[%s83_s11] sm:$0x1]  ;;  %s103_s19 = scalar_lea.vmem %s2185_s1, %s1754_s4  ;;  %s1321_s28 = sshll.u32 %s1611_s27, 4  ;;  %s1322_s28 = int_to_ptr.vmem [resolvable:$true] %s1321_s28 }
  0x20   :  { %65 = vst.msk [vmem:[#allocation2] sm:$0x1] %vm64_vm1, %v63_v14  ;;  %1365 = vmatmul.msk.f32.vlgmr.msra.gmra.mxu0 %vm44_vm0, %v1706_v15  ;;  %v89_v32 = vld [vmem:[%s88_s15] sm:$0x1]  ;;  %s108_s22 = scalar_lea.vmem %s2185_s1, %s1766_s8  ;;  %462 = vmatpush.msrb.mxu1 %v1811_v36  ;;  %s1323_s4 = sshll.u32 %s2187_s3, 4  ;;  %s1324_s4 = int_to_ptr.hbm [resolvable:$true] %s1323_s4 }
  0x21   :  { %70 = vst.msk [vmem:[#allocation2 + $0x1] sm:$0x1] %vm64_vm1, %v69_v16  ;;  %v104_v35 = vld [vmem:[%s103_s19] sm:$0x1]  ;;  %s93_s23 = scalar_lea.vmem %s2185_s1, %s1777_s12  ;;  %564 = vmatpush.msrb.mxu3 %v1811_v36 }
  0x22   :  { %66 = vst.msk [vmem:[#allocation3 + $0x38] sm:$0x1] %vm64_vm1, %v63_v14  ;;  %v109_v37 = vld [vmem:[%s108_s22] sm:$0x1]  ;;  %s98_s26 = scalar_lea.vmem %s2185_s1, %s1785_s16  ;;  %463 = vmatpush.msrb.mxu1 %v1838_v43  ;;  %s1610_s1 = smov 64  }
  0x23   :  { %71 = vst.msk [vmem:[#allocation3 + $0x39] sm:$0x1] %vm64_vm1, %v69_v16  ;;  %v94_v39 = vld [vmem:[%s93_s23] sm:$0x1]  ;;  %565 = vmatpush.msrb.mxu3 %v1838_v43 }
  0x24   :  { %135 = vst.msk [vmem:[#allocation2 + $0x38] sm:$0x1] %vm64_vm1, %v134_v11  ;;  %v99_v40 = vld [vmem:[%s98_s26] sm:$0x1]  ;;  %464 = vmatpush.msrb.mxu1 %v1855_v48 }
  0x25   :  { %140 = vst.msk [vmem:[#allocation2 + $0x39] sm:$0x1] %vm64_vm1, %v139_v12  ;;  %566 = vmatpush.msrb.mxu3 %v1855_v48  ;;  %v1874_v58 = vld [vmem:[#allocation8 + $0xe0] sm:$0xff] }
  0x26   :  { %126 = vst.msk [vmem:[#allocation3 + $0x8] sm:$0x1] %vm64_vm1, %v124_v17  ;;  %661 = vmatpush.msra.mxu1 %v1650_v9  ;;  %438 = vmatpush.msrb.mxu0 %v1874_v58  ;;  %v158_v0 = vld [vmem:[#allocation8] sm:$0xff] }
  0x27   :  { %131 = vst.msk [vmem:[#allocation3 + $0x9] sm:$0x1] %vm64_vm1, %v129_v20  ;;  %v1890_v1 = vld [vmem:[#allocation8 + $0xc0] sm:$0xff]  ;;  %319 = vmatpush.msrb.mxu2 %v158_v0 }
  0x28   :  { %v1756_v23 = vld [vmem:[#allocation2] sm:$0xff]  ;;  %125 = vst.msk [vmem:[#allocation2 + $0x30] sm:$0x1] %vm64_vm1, %v124_v17  ;;  %662 = vmatpush.msra.mxu1 %v1661_v10  ;;  %439 = vmatpush.msrb.mxu0 %v1879_v61 }
  0x29   :  { %1389 = vmatmul.msk.f32.vlgmr.msra.gmra.mxu3 %vm44_vm0, %v1756_v23  ;;  %130 = vst.msk [vmem:[#allocation2 + $0x31] sm:$0x1] %vm64_vm1, %v129_v20  ;;  %v1901_v5 = vld [vmem:[#allocation8 + $0xa0] sm:$0xff] }
  0x2a   :  { %75 = vst.msk [vmem:[#allocation2 + $0x8] sm:$0x1] %vm64_vm1, %v74_v22  ;;  %v1840_v44 = vld [vmem:[#allocation3 + $0x38] sm:$0xff]  ;;  %763 = vmatpush.msra.mxu3 %v1650_v9  ;;  %663 = vmatpush.msra.mxu1 %v1694_v13  ;;  %v1914_v7 = vld [vmem:[#allocation8 + $0x80] sm:$0xff] }
  0x2b   :  { %80 = vst.msk [vmem:[#allocation2 + $0x9] sm:$0x1] %vm64_vm1, %v79_v24  ;;  %1372 = vmatmul.msk.f32.vlgmr.msra.gmra.mxu2 %vm44_vm0, %v1840_v44  ;;  %440 = vmatpush.msrb.mxu0 %v1890_v1  ;;  %v387_v15 = vld [vmem:[#allocation8 + $0x100] ss:$8 sm:$0x3] }
  0x2c   :  { %76 = vst.msk [vmem:[#allocation3 + $0x30] sm:$0x1] %vm64_vm1, %v74_v22  ;;  %764 = vmatpush.msra.mxu3 %v1661_v10  ;;  %v1883_v62 = vld [vmem:[#allocation2 + $0x38] sm:$0xff]  ;;  %664 = vmatpush.msra.mxu1 %v1732_v18  ;;  %v390_v19 = vperm.slane %v387_v15, 1 }
  0x2d   :  { %81 = vst.msk [vmem:[#allocation3 + $0x31] sm:$0x1] %vm64_vm1, %v79_v24  ;;  %441 = vmatpush.msrb.mxu0 %v1894_v3  ;;  %539 = vmatpush.msra.mxu2 %v1869_v56 }
  0x2e   :  { %v151_v30 = vld [vmem:[#allocation3 + $0x8] sm:$0xff]  ;;  %116 = vst.msk [vmem:[#allocation3 + $0x10] sm:$0x1] %vm64_vm1, %v114_v25  ;;  %765 = vmatpush.msra.mxu3 %v1694_v13  ;;  %665 = vmatpush.msra.mxu1 %v1770_v26 }
  0x2f   :  { %1374 = vmatmul.msk.f32.gmra.mxu1 %vm44_vm0, %v151_v30  ;;  %121 = vst.msk [vmem:[#allocation3 + $0x11] sm:$0x1] %vm64_vm1, %v119_v29  ;;  %1366 = vmatmul.msk.f32.gmra.mxu0 %vm44_vm0, %v151_v30 }
  0x30   :  { %115 = vst.msk [vmem:[#allocation2 + $0x28] sm:$0x1] %vm64_vm1, %v114_v25  ;;  %v1871_v57 = vld [vmem:[#allocation2 + $0x30] sm:$0xff]  ;;  %442 = vmatpush.msrb.mxu0 %v1901_v5  ;;  %766 = vmatpush.msra.mxu3 %v1732_v18 }
  0x31   :  { %120 = vst.msk [vmem:[#allocation2 + $0x29] sm:$0x1] %vm64_vm1, %v119_v29  ;;  %540 = vmatpush.msra.mxu2 %v1874_v58  ;;  %666 = vmatpush.msra.mxu1 %v1811_v36 }
  0x32   :  { %v1803_v33 = vld [vmem:[#allocation2 + $0x8] sm:$0xff]  ;;  %85 = vst.msk [vmem:[#allocation2 + $0x10] sm:$0x1] %vm64_vm1, %v84_v31  ;;  %443 = vmatpush.msrb.mxu0 %v1906_v6  ;;  %767 = vmatpush.msra.mxu3 %v1770_v26 }
  0x33   :  { %1390 = vmatmul.msk.f32.gmra.mxu3 %vm44_vm0, %v1803_v33  ;;  %v1242_v34 = vmax.f32 %v1756_v23, %v1803_v33  ;;  %90 = vst.msk [vmem:[#allocation2 + $0x11] sm:$0x1] %vm64_vm1, %v89_v32  ;;  %1381 = vmatmul.msk.f32.vlgmr.msrb.gmra.mxu2 %vm44_vm0, %v1756_v23 }
  0x34   :  { %86 = vst.msk [vmem:[#allocation3 + $0x28] sm:$0x1] %vm64_vm1, %v84_v31  ;;  %v156_v8 = vld [vmem:[#allocation3 + $0x30] sm:$0xff]  ;;  %541 = vmatpush.msra.mxu2 %v1879_v61  ;;  %444 = vmatpush.msrb.mxu0 %v1914_v7 }
  0x35   :  { %91 = vst.msk [vmem:[#allocation3 + $0x29] sm:$0x1] %vm64_vm1, %v89_v32  ;;  %667 = vmatpush.msra.mxu1 %v1838_v43  ;;  %768 = vmatpush.msra.mxu3 %v1811_v36 }
  0x36   :  { %v152_v38 = vld [vmem:[#allocation3 + $0x10] sm:$0xff]  ;;  %106 = vst.msk [vmem:[#allocation3 + $0x18] sm:$0x1] %vm64_vm1, %v104_v35  ;;  %641 = vmatpush.msra.mxu0 %v1869_v56  ;;  %542 = vmatpush.msra.mxu2 %v1890_v1 }
  0x37   :  { %1375 = vmatmul.msk.f32.gmra.mxu1 %vm44_vm0, %v152_v38  ;;  %111 = vst.msk [vmem:[#allocation3 + $0x19] sm:$0x1] %vm64_vm1, %v109_v37  ;;  %1367 = vmatmul.msk.f32.gmra.mxu0 %vm44_vm0, %v152_v38 }
  0x38   :  { %105 = vst.msk [vmem:[#allocation2 + $0x20] sm:$0x1] %vm64_vm1, %v104_v35  ;;  %v1864_v52 = vld [vmem:[#allocation2 + $0x28] sm:$0xff]  ;;  %668 = vmatpush.msra.mxu1 %v1855_v48  ;;  %642 = vmatpush.msra.mxu0 %v1874_v58 }
  0x39   :  { %110 = vst.msk [vmem:[#allocation2 + $0x21] sm:$0x1] %vm64_vm1, %v109_v37  ;;  %543 = vmatpush.msra.mxu2 %v1894_v3  ;;  %769 = vmatpush.msra.mxu3 %v1838_v43 }
  0x3a   :  { %v1831_v41 = vld [vmem:[#allocation2 + $0x10] sm:$0xff]  ;;  %95 = vst.msk [vmem:[#allocation2 + $0x18] sm:$0x1] %vm64_vm1, %v94_v39  ;;  %643 = vmatpush.msra.mxu0 %v1879_v61 }
  0x3b   :  { %1391 = vmatmul.msk.f32.gmra.mxu3 %vm44_vm0, %v1831_v41  ;;  %v1243_v42 = vmax.f32 %v1242_v34, %v1831_v41  ;;  %100 = vst.msk [vmem:[#allocation2 + $0x19] sm:$0x1] %vm64_vm1, %v99_v40  ;;  %1382 = vmatmul.msk.f32.gmra.mxu2 %vm44_vm0, %v1803_v33 }
  0x3c   :  { %96 = vst.msk [vmem:[#allocation3 + $0x20] sm:$0x1] %vm64_vm1, %v94_v39  ;;  %v155_v2 = vld [vmem:[#allocation3 + $0x28] sm:$0xff]  ;;  %544 = vmatpush.msra.mxu2 %v1901_v5  ;;  %644 = vmatpush.msra.mxu0 %v1890_v1 }
  0x3d   :  { %101 = vst.msk [vmem:[#allocation3 + $0x21] sm:$0x1] %vm64_vm1, %v99_v40  ;;  %770 = vmatpush.msra.mxu3 %v1855_v48 }
  0x3e   :  { %v153_v45 = vld [vmem:[#allocation3 + $0x18] sm:$0xff]  ;;  %645 = vmatpush.msra.mxu0 %v1894_v3  ;;  %545 = vmatpush.msra.mxu2 %v1906_v6 }
  0x3f   :  { %1376 = vmatmul.msk.f32.gmra.mxu1 %vm44_vm0, %v153_v45  ;;  %1368 = vmatmul.msk.f32.gmra.mxu0 %vm44_vm0, %v153_v45 }
  0x40   :  { %v1857_v50 = vld [vmem:[#allocation2 + $0x20] sm:$0xff]  ;;  %646 = vmatpush.msra.mxu0 %v1901_v5  ;;  %546 = vmatpush.msra.mxu2 %v1914_v7 }
  0x42   :  { %v1850_v46 = vld [vmem:[#allocation2 + $0x18] sm:$0xff]  ;;  %647 = vmatpush.msra.mxu0 %v1906_v6  ;;  %743 = vmatpush.msrb.mxu2 %v1869_v56 }
  0x43   :  { %1392 = vmatmul.msk.f32.gmra.mxu3 %vm44_vm0, %v1850_v46  ;;  %v1244_v47 = vmax.f32 %v1243_v42, %v1850_v46  ;;  %1383 = vmatmul.msk.f32.gmra.mxu2 %vm44_vm0, %v1831_v41 }
  0x44   :  { %v154_v49 = vld [vmem:[#allocation3 + $0x20] sm:$0xff]  ;;  %648 = vmatpush.msra.mxu0 %v1914_v7  ;;  %744 = vmatpush.msrb.mxu2 %v1874_v58 }
  0x45   :  { %v1245_v51 = vmax.f32 %v1244_v47, %v1857_v50 }
  0x46   :  { %745 = vmatpush.msrb.mxu2 %v1879_v61 }
  0x47   :  { %1377 = vmatmul.msk.f32.gmra.mxu1 %vm44_vm0, %v154_v49  ;;  %v1246_v53 = vmax.f32 %v1245_v51, %v1864_v52  ;;  %1369 = vmatmul.msk.f32.gmra.mxu0 %vm44_vm0, %v154_v49 }
  0x48   :  { %746 = vmatpush.msrb.mxu2 %v1890_v1 }
  0x49   :  { %v1877_v59 = vmax.f32 %v1246_v53, %v1871_v57 }
  0x4a   :  { %747 = vmatpush.msrb.mxu2 %v1894_v3 }
  0x4b   :  { %1393 = vmatmul.msk.f32.gmra.mxu3 %vm44_vm0, %v1857_v50  ;;  %v1248_v63 = vmax.f32 %v1877_v59, %v1883_v62  ;;  %1384 = vmatmul.msk.f32.gmra.mxu2 %vm44_vm0, %v1850_v46 }
  0x4c   :  { %748 = vmatpush.msrb.mxu2 %v1901_v5 }
  0x4e   :  { %749 = vmatpush.msrb.mxu2 %v1906_v6 }
  0x4f   :  { %1378 = vmatmul.msk.f32.gmra.mxu1 %vm44_vm0, %v155_v2  ;;  %1370 = vmatmul.msk.f32.gmra.mxu0 %vm44_vm0, %v155_v2 }
  0x50   :  { %750 = vmatpush.msrb.mxu2 %v1914_v7 }
  0x53   :  { %1394 = vmatmul.msk.f32.gmra.mxu3 %vm44_vm0, %v1864_v52  ;;  %1385 = vmatmul.msk.f32.gmra.mxu2 %vm44_vm0, %v1857_v50 }
  0x57   :  { %1379 = vmatmul.msk.f32.gmra.mxu1 %vm44_vm0, %v156_v8  ;;  %1371 = vmatmul.msk.f32.gmra.mxu0 %vm44_vm0, %v156_v8 }
  0x5b   :  { %1395 = vmatmul.msk.f32.gmra.mxu3 %vm44_vm0, %v1871_v57  ;;  %1386 = vmatmul.msk.f32.gmra.mxu2 %vm44_vm0, %v1864_v52 }
  0x5f   :  { %1380 = vmatmul.msk.f32.gmra.mxu1 %vm44_vm0, %v1840_v44  ;;  %445 = vmatmul.f32.vlgmr.msrb.gmra.mxu0 %v1609_v4 }
  0x60   :  { %845 = vmatpush.msrb.mxu0 %v1869_v56 }
  0x62   :  { %846 = vmatpush.msrb.mxu0 %v1874_v58 }
  0x63   :  { %1396 = vmatmul.msk.f32.gmra.mxu3 %vm44_vm0, %v1883_v62  ;;  %1387 = vmatmul.msk.f32.gmra.mxu2 %vm44_vm0, %v1871_v57 }
  0x64   :  { %847 = vmatpush.msrb.mxu0 %v1879_v61 }
  0x66   :  { %848 = vmatpush.msrb.mxu0 %v1890_v1 }
  0x67   :  { %465 = vmatmul.f32.vlgmr.msrb.gmra.mxu1 %v1609_v4 }
  0x68   :  { %865 = vmatpush.msrb.mxu1 %v1650_v9  ;;  %849 = vmatpush.msrb.mxu0 %v1894_v3 }
  0x6a   :  { %866 = vmatpush.msrb.mxu1 %v1661_v10  ;;  %850 = vmatpush.msrb.mxu0 %v1901_v5 }
  0x6b   :  { %1388 = vmatmul.msk.f32.gmra.mxu2 %vm44_vm0, %v1883_v62 }
  0x6c   :  { %867 = vmatpush.msrb.mxu1 %v1694_v13  ;;  %851 = vmatpush.msrb.mxu0 %v1906_v6 }
  0x6e   :  { %868 = vmatpush.msrb.mxu1 %v1732_v18  ;;  %852 = vmatpush.msrb.mxu0 %v1914_v7 }
  0x70   :  { %869 = vmatpush.msrb.mxu1 %v1770_v26 }
  0x72   :  { %870 = vmatpush.msrb.mxu1 %v1811_v36 }
  0x74   :  { %871 = vmatpush.msrb.mxu1 %v1838_v43 }
  0x76   :  { %872 = vmatpush.msrb.mxu1 %v1855_v48 }
  0x9c   :  { %v256_v4 = vpop.f32.mrf.mxu1 }
  0x9d   :  { %v215_v31 = vpop.f32.mrf.mxu0 }
  0xac   :  { %v362_v11 = vpop.f32.mrf.mxu3  ;;  %v259_v12 = vpop.f32.mrf.mxu1 }
  0xad   :  { %v1999_v40 = vpop.f32.mrf.mxu0  ;;  %v363_v46 = vadd.f32 %v362_v11, %v256_v4 }
  0xae   :  { %v1997_v35 = vpop.f32.mrf.mxu2 }
  0xaf   :  { %v394_v52 = vadd.f32 %v390_v19, %v363_v46 }
  0xb4   :  { %v262_v14 = vpop.f32.mrf.mxu1 }
  0xb5   :  { %v221_v50 = vpop.f32.mrf.mxu0 }
  0xb6   :  { %v365_v16 = vpop.f32.mrf.mxu3  ;;  %v321_v42 = vpop.f32.mrf.mxu2 }
  0xb7   :  { %v366_v17 = vadd.f32 %v365_v16, %v259_v12 }
  0xb9   :  { %v1989_v20 = vadd.f32 %v390_v19, %v366_v17 }
  0xbc   :  { %v265_v21 = vpop.f32.mrf.mxu1 }
  0xbd   :  { %v224_v8 = vpop.f32.mrf.mxu0 }
  0xbe   :  { %v368_v22 = vpop.f32.mrf.mxu3  ;;  %v2005_v51 = vpop.f32.mrf.mxu2 }
  0xbf   :  { %v369_v23 = vadd.f32 %v368_v22, %v262_v14 }
  0xc1   :  { %v1991_v24 = vadd.f32 %v390_v19, %v369_v23 }
  0xc4   :  { %v268_v25 = vpop.f32.mrf.mxu1 }
  0xc5   :  { %v227_v14 = vpop.f32.mrf.mxu0 }
  0xc6   :  { %v371_v27 = vpop.f32.mrf.mxu3  ;;  %v327_v0 = vpop.f32.mrf.mxu2 }
  0xc7   :  { %v372_v28 = vadd.f32 %v371_v27, %v265_v21  ;;  %v2009_v2 = vadd.f32 %v327_v0, %v221_v50 }
  0xc9   :  { %v1993_v29 = vadd.f32 %v390_v19, %v372_v28  ;;  %v322_v28 = vadd.f32 %v321_v42, %v215_v31 }
  0xcc   :  { %v271_v30 = vpop.f32.mrf.mxu1 }
  0xcd   :  { %v230_v21 = vpop.f32.mrf.mxu0 }
  0xce   :  { %v374_v32 = vpop.f32.mrf.mxu3  ;;  %v330_v4 = vpop.f32.mrf.mxu2 }
  0xcf   :  { %v375_v33 = vadd.f32 %v374_v32, %v268_v25  ;;  %v2012_v11 = vadd.f32 %v330_v4, %v224_v8 }
  0xd1   :  { %v1995_v34 = vadd.f32 %v390_v19, %v375_v33 }
  0xd4   :  { %v274_v37 = vpop.f32.mrf.mxu1 }
  0xd6   :  { %v377_v38 = vpop.f32.mrf.mxu3  ;;  %v333_v16 = vpop.f32.mrf.mxu2 }
  0xd7   :  { %v378_v39 = vadd.f32 %v377_v38, %v271_v30  ;;  %v2014_v17 = vadd.f32 %v333_v16, %v227_v14  ;;  %v2020_v30 = vperm.slane %v387_v15, 0 }
  0xd9   :  { %v2001_v41 = vadd.f32 %v390_v19, %v378_v39  ;;  %v393_v32 = vadd.f32 %v2020_v30, %v322_v28 }
  0xdc   :  { %v277_v44 = vpop.f32.mrf.mxu1 }
  0xde   :  { %v380_v45 = vpop.f32.mrf.mxu3  ;;  %v336_v22 = vpop.f32.mrf.mxu2 }
  0xdf   :  { %v381_v47 = vadd.f32 %v380_v45, %v274_v37  ;;  %v2016_v23 = vadd.f32 %v336_v22, %v230_v21 }
  0xe1   :  { %v2003_v49 = vadd.f32 %v390_v19, %v381_v47 }
  0xe4   :  { %v466_v53 = vpop.f32.mrf.mxu1 }
  0xe5   :  { %v470_v54 = vadd.f32 %v466_v53, %v394_v52 }
  0xe6   :  { %v383_v55 = vpop.f32.mrf.mxu3  ;;  %v339_v25 = vpop.f32.mrf.mxu2 }
  0xe7   :  { %v384_v57 = vadd.f32 %v383_v55, %v277_v44  ;;  %1440 = vtanh.f32 %v470_v54  ;;  %v1398_v16 = vmul.f32 -1.442695, %v470_v54 }
  0xe9   :  { %v2007_v60 = vadd.f32 %v390_v19, %v384_v57  ;;  %v233_v19 = vpop.f32.mrf.mxu0 }
  0xea   :  { %v2018_v27 = vadd.f32 %v339_v25, %v233_v19 }
  0xed   :  { %v1441_v12 = vpop.eup %1440 }
  0xee   :  { %512 = vrot.lane.b32.xlu0 %v1441_v12, %s1610_s1 }
  0xf1   :  { %v446_v33 = vpop.f32.mrf.mxu0 }
  0xf2   :  { %v469_v37 = vadd.f32 %v446_v33, %v393_v32 }
  0xf4   :  { %v1397_v38 = vmul.f32 -1.442695, %v469_v37 }
  0xf6   :  { %1442 = vpow2.f32 %v1397_v38 }
  0xfc   :  { %v1443_v39 = vpop.eup %1442 }
  0xfd   :  { %v477_v44 = vadd.f32 1.0, %v1443_v39 }
  0xff   :  { %1444 = vrcp.f32 %v477_v44  ;;  %vm484_vm2 = vweird.f32 %v477_v44  ;;  %v490_v52 = vand.u32 2147483648, %v477_v44  ;;  %v488_v31 = vand.u32 2147483647, %v477_v44 }
 0x101   :  { %v491_v15 = vor.u32 1.1754944e-38, %v490_v52  ;;  %vm489_vm5 = vcmp.eq.f32.partialorder %v488_v31, 8.507059e+37  ;;  %v325_v31 = vadd.f32 %v2005_v51, %v1999_v40 }
 0x105   :  { %v1445_v45 = vpop.eup %1444 }
 0x106   :  { %v480_v46 = vmul.f32 %v1445_v45, %v477_v44  ;;  %vm485_vm3 = vweird.f32 %v1445_v45 }
 0x107   :  { %vm486_vm4 = vmor %vm484_vm2, %vm485_vm3 }
 0x108   :  { %v481_v47 = vsub.f32 1.0, %v480_v46 }
 0x10a   :  { %v482_v50 = vmul.f32 %v1445_v45, %v481_v47 }
 0x10c   :  { %v483_v53 = vadd.f32 %v1445_v45, %v482_v50 }
 0x10e   :  { %v487_v42 = vsel %vm486_vm4, %v1445_v45, %v483_v53  ;;  %v2052_v53 = vpop.f32.mrf.mxu2 }
 0x10f   :  { %v492_v57 = vsel %vm489_vm5, %v491_v15, %v487_v42  ;;  %v395_v42 = vadd.f32 %v2020_v30, %v325_v31 }
 0x110   :  { %v510_v8 = vmul.f32 0.0, %v492_v57 }
 0x160   :  { %v513_v55 = vpop.permute.xlu0 %512 }
 0x161   :  { %v515_v0 = vmul.f32 %v513_v55, %v492_v57 }
 0x163   :  { %517 = vrot.lane.b32.xlu0 %v515_v0, %s1610_s1 }
 0x1d5   :  { %v518_v12 = vpop.permute.xlu0 %517 }
 0x1d6   :  { %v2024_v4 = vadd.f32 %v518_v12, %v510_v8 }
 0x1d8   :  { %1446 = vtanh.f32 %v2024_v4 }
 0x1d9   :  { %1448 = vpow2.f32 %v1398_v16 }
 0x1de   :  { %v1447_v14 = vpop.eup %1446 }
 0x1df   :  { %523 = vrot.lane.b32.xlu1 %v1447_v14, %s1610_s1  ;;  %v1449_v21 = vpop.eup %1448 }
 0x1e0   :  { %v478_v22 = vadd.f32 1.0, %v1449_v21 }
 0x1e2   :  { %1450 = vrcp.f32 %v478_v22  ;;  %v505_v37 = vand.u32 2147483648, %v478_v22  ;;  %vm499_vm7 = vweird.f32 %v478_v22  ;;  %v503_v38 = vand.u32 2147483647, %v478_v22 }
 0x1e4   :  { %v506_v44 = vor.u32 1.1754944e-38, %v505_v37  ;;  %vm504_vm9 = vcmp.eq.f32.partialorder %v503_v38, 8.507059e+37 }
 0x1e8   :  { %v1451_v19 = vpop.eup %1450 }
 0x1e9   :  { %v495_v25 = vmul.f32 %v1451_v19, %v478_v22  ;;  %vm500_vm6 = vweird.f32 %v1451_v19 }
 0x1ea   :  { %vm501_vm8 = vmor %vm499_vm7, %vm500_vm6 }
 0x1eb   :  { %v496_v28 = vsub.f32 1.0, %v495_v25 }
 0x1ed   :  { %v497_v32 = vmul.f32 %v1451_v19, %v496_v28 }
 0x1ef   :  { %v498_v33 = vadd.f32 %v1451_v19, %v497_v32 }
 0x1f1   :  { %v502_v39 = vsel %vm501_vm8, %v1451_v19, %v498_v33 }
 0x1f2   :  { %v507_v45 = vsel %vm504_vm9, %v506_v44, %v502_v39 }
 0x251   :  { %v524_v46 = vpop.permute.xlu1 %523 }
 0x252   :  { %v2028_v54 = vmul.f32 %v524_v46, %v507_v45 }
 0x254   :  { %1399 = vmatmul.msk.f32.vlgmr.msra.gmra.mxu2 %vm425_vm10, %v2028_v54  ;;  %1400 = vmatmul.msk.f32.vlgmr.msrb.gmra.mxu3 %vm425_vm10, %v2028_v54 }
 0x255   :  { %947 = vmatpush.msra.mxu2 %v1869_v56  ;;  %967 = vmatpush.msrb.mxu3 %v1650_v9 }
 0x257   :  { %948 = vmatpush.msra.mxu2 %v1874_v58  ;;  %968 = vmatpush.msrb.mxu3 %v1661_v10 }
 0x259   :  { %949 = vmatpush.msra.mxu2 %v1879_v61  ;;  %969 = vmatpush.msrb.mxu3 %v1694_v13 }
 0x25b   :  { %950 = vmatpush.msra.mxu2 %v1890_v1  ;;  %970 = vmatpush.msrb.mxu3 %v1732_v18 }
 0x25d   :  { %951 = vmatpush.msra.mxu2 %v1894_v3  ;;  %971 = vmatpush.msrb.mxu3 %v1770_v26 }
 0x25f   :  { %952 = vmatpush.msra.mxu2 %v1901_v5  ;;  %972 = vmatpush.msrb.mxu3 %v1811_v36 }
 0x261   :  { %953 = vmatpush.msra.mxu2 %v1906_v6  ;;  %973 = vmatpush.msrb.mxu3 %v1838_v43 }
 0x263   :  { %954 = vmatpush.msra.mxu2 %v1914_v7  ;;  %974 = vmatpush.msrb.mxu3 %v1855_v48 }
 0x2d7   :  { %v568_v47 = vpop.f32.mrf.mxu3  ;;  %v548_v15 = vpop.f32.mrf.mxu2 }
 0x2d8   :  { %v572_v50 = vadd.f32 %v568_v47, %v1989_v20  ;;  %v571_v55 = vadd.f32 %v548_v15, %v395_v42 }
 0x2da   :  { %1452 = vtanh.f32 %v572_v50  ;;  %v1401_v57 = vmul.f32 -1.442695, %v571_v55  ;;  %v1402_v44 = vmul.f32 -1.442695, %v572_v50  ;;  %v527_v50 = vmax.f32 %v2028_v54, 0.0 }
 0x2dc   :  { %1454 = vpow2.f32 %v1401_v57 }
 0x2e0   :  { %v1453_v52 = vpop.eup %1452 }
 0x2e1   :  { %614 = vrot.lane.b32.xlu1 %v1453_v52, %s1610_s1 }
 0x2e2   :  { %v1455_v0 = vpop.eup %1454 }
 0x2e3   :  { %v579_v8 = vadd.f32 1.0, %v1455_v0 }
 0x2e5   :  { %1456 = vrcp.f32 %v579_v8  ;;  %v592_v22 = vand.u32 2147483648, %v579_v8  ;;  %vm586_vm12 = vweird.f32 %v579_v8  ;;  %v590_v19 = vand.u32 2147483647, %v579_v8 }
 0x2e7   :  { %v593_v51 = vor.u32 1.1754944e-38, %v592_v22  ;;  %vm591_vm14 = vcmp.eq.f32.partialorder %v590_v19, 8.507059e+37 }
 0x2eb   :  { %v1457_v12 = vpop.eup %1456 }
 0x2ec   :  { %v582_v20 = vmul.f32 %v1457_v12, %v579_v8  ;;  %vm587_vm11 = vweird.f32 %v1457_v12 }
 0x2ed   :  { %vm588_vm13 = vmor %vm586_vm12, %vm587_vm11 }
 0x2ee   :  { %v583_v14 = vsub.f32 1.0, %v582_v20 }
 0x2f0   :  { %v584_v16 = vmul.f32 %v1457_v12, %v583_v14 }
 0x2f2   :  { %v585_v21 = vadd.f32 %v1457_v12, %v584_v16  ;;  %v397_v16 = vadd.f32 %v2020_v30, %v2009_v2 }
 0x2f4   :  { %v589_v40 = vsel %vm588_vm13, %v1457_v12, %v585_v21 }
 0x2f5   :  { %v594_v28 = vsel %vm591_vm14, %v593_v51, %v589_v40 }
 0x2f6   :  { %v612_v33 = vmul.f32 %v594_v28, %v2024_v4 }
 0x353   :  { %v615_v25 = vpop.permute.xlu1 %614 }
 0x354   :  { %v617_v32 = vmul.f32 %v615_v25, %v594_v28 }
 0x356   :  { %619 = vrot.lane.b32.xlu2 %v617_v32, %s1610_s1 }
 0x3b0   :  { %v620_v37 = vpop.permute.xlu2 %619 }
 0x3b1   :  { %v2059_v38 = vadd.f32 %v620_v37, %v612_v33 }
 0x3b3   :  { %1458 = vtanh.f32 %v2059_v38 }
 0x3b4   :  { %1460 = vpow2.f32 %v1402_v44 }
 0x3b9   :  { %v1459_v39 = vpop.eup %1458 }
 0x3ba   :  { %625 = vrot.lane.b32.xlu2 %v1459_v39, %s1610_s1  ;;  %v1461_v45 = vpop.eup %1460 }
 0x3bb   :  { %v580_v46 = vadd.f32 1.0, %v1461_v45 }
 0x3bd   :  { %1462 = vrcp.f32 %v580_v46  ;;  %v607_v4 = vand.u32 2147483648, %v580_v46  ;;  %vm601_vm1 = vweird.f32 %v580_v46  ;;  %v605_v55 = vand.u32 2147483647, %v580_v46 }
 0x3bf   :  { %v608_v0 = vor.u32 1.1754944e-38, %v607_v4  ;;  %vm606_vm3 = vcmp.eq.f32.partialorder %v605_v55, 8.507059e+37 }
 0x3c3   :  { %v1463_v47 = vpop.eup %1462 }
 0x3c4   :  { %v597_v52 = vmul.f32 %v1463_v47, %v580_v46  ;;  %vm602_vm15 = vweird.f32 %v1463_v47 }
 0x3c5   :  { %vm603_vm2 = vmor %vm601_vm1, %vm602_vm15 }
 0x3c6   :  { %v598_v31 = vsub.f32 1.0, %v597_v52 }
 0x3c8   :  { %v599_v15 = vmul.f32 %v1463_v47, %v598_v31 }
 0x3ca   :  { %v600_v42 = vadd.f32 %v1463_v47, %v599_v15 }
 0x3cc   :  { %v604_v57 = vsel %vm603_vm2, %v1463_v47, %v600_v42 }
 0x3cd   :  { %v609_v8 = vsel %vm606_vm3, %v608_v0, %v604_v57 }
 0x414   :  { %v626_v12 = vpop.permute.xlu2 %625 }
 0x415   :  { %v628_v20 = vmul.f32 %v626_v12, %v609_v8 }
 0x417   :  { %v2064_v14 = vmax.f32 %v527_v50, %v628_v20  ;;  %1403 = vmatmul.msk.f32.vlgmr.msra.gmra.mxu0 %vm425_vm10, %v628_v20  ;;  %1404 = vmatmul.msk.f32.vlgmr.msra.gmra.mxu1 %vm425_vm10, %v628_v20 }
 0x418   :  { %1049 = vmatpush.msra.mxu0 %v1869_v56  ;;  %1069 = vmatpush.msra.mxu1 %v1650_v9 }
 0x41a   :  { %1050 = vmatpush.msra.mxu0 %v1874_v58  ;;  %1070 = vmatpush.msra.mxu1 %v1661_v10 }
 0x41c   :  { %1051 = vmatpush.msra.mxu0 %v1879_v61  ;;  %1071 = vmatpush.msra.mxu1 %v1694_v13 }
 0x41e   :  { %1052 = vmatpush.msra.mxu0 %v1890_v1  ;;  %1072 = vmatpush.msra.mxu1 %v1732_v18 }
 0x420   :  { %1053 = vmatpush.msra.mxu0 %v1894_v3  ;;  %1073 = vmatpush.msra.mxu1 %v1770_v26 }
 0x422   :  { %1054 = vmatpush.msra.mxu0 %v1901_v5  ;;  %1074 = vmatpush.msra.mxu1 %v1811_v36 }
 0x424   :  { %1055 = vmatpush.msra.mxu0 %v1906_v6  ;;  %1075 = vmatpush.msra.mxu1 %v1838_v43 }
 0x426   :  { %1056 = vmatpush.msra.mxu0 %v1914_v7  ;;  %1076 = vmatpush.msra.mxu1 %v1855_v48 }
 0x494   :  { %v670_v9 = vpop.f32.mrf.mxu1  ;;  %v650_v54 = vpop.f32.mrf.mxu0 }
 0x495   :  { %v674_v10 = vadd.f32 %v670_v9, %v1991_v24  ;;  %v673_v21 = vadd.f32 %v650_v54, %v397_v16 }
 0x497   :  { %1464 = vtanh.f32 %v674_v10  ;;  %v1405_v22 = vmul.f32 -1.442695, %v673_v21  ;;  %v1406_v42 = vmul.f32 -1.442695, %v674_v10 }
 0x499   :  { %1466 = vpow2.f32 %v1405_v22  ;;  %v1536_v22 = vld [vmem:[#allocation8 + $0xf8] sm:$0xff] }
 0x49d   :  { %v1465_v13 = vpop.eup %1464 }
 0x49e   :  { %716 = vrot.lane.b32.xlu0 %v1465_v13, %s1610_s1 }
 0x49f   :  { %v1467_v19 = vpop.eup %1466 }
 0x4a0   :  { %v681_v40 = vadd.f32 1.0, %v1467_v19  ;;  %v1537_v19 = vld [vmem:[#allocation8 + $0xe8] sm:$0xff] }
 0x4a2   :  { %1468 = vrcp.f32 %v681_v40  ;;  %v694_v24 = vand.u32 2147483648, %v681_v40  ;;  %vm688_vm5 = vweird.f32 %v681_v40  ;;  %v692_v37 = vand.u32 2147483647, %v681_v40 }
 0x4a4   :  { %v695_v44 = vor.u32 1.1754944e-38, %v694_v24  ;;  %vm693_vm7 = vcmp.eq.f32.partialorder %v692_v37, 8.507059e+37 }
 0x4a8   :  { %v1469_v51 = vpop.eup %1468 }
 0x4a9   :  { %v684_v25 = vmul.f32 %v1469_v51, %v681_v40  ;;  %vm689_vm4 = vweird.f32 %v1469_v51  ;;  %v1538_v40 = vld [vmem:[#allocation8 + $0xd8] sm:$0xff] }
 0x4aa   :  { %vm690_vm6 = vmor %vm688_vm5, %vm689_vm4 }
 0x4ab   :  { %v685_v28 = vsub.f32 1.0, %v684_v25 }
 0x4ad   :  { %v686_v32 = vmul.f32 %v1469_v51, %v685_v28 }
 0x4af   :  { %v687_v33 = vadd.f32 %v1469_v51, %v686_v32 }
 0x4b1   :  { %v691_v39 = vsel %vm690_vm6, %v1469_v51, %v687_v33 }
 0x4b2   :  { %v696_v45 = vsel %vm693_vm7, %v695_v44, %v691_v39 }
 0x4b3   :  { %v714_v47 = vmul.f32 %v696_v45, %v2059_v38 }
 0x510   :  { %v717_v2 = vpop.permute.xlu0 %716 }
 0x511   :  { %v719_v46 = vmul.f32 %v717_v2, %v696_v45 }
 0x513   :  { %721 = vrot.lane.b32.xlu1 %v719_v46, %s1610_s1 }
 0x585   :  { %v722_v52 = vpop.permute.xlu1 %721 }
 0x586   :  { %v2090_v31 = vadd.f32 %v722_v52, %v714_v47 }
 0x588   :  { %1470 = vtanh.f32 %v2090_v31 }
 0x589   :  { %1472 = vpow2.f32 %v1406_v42 }
 0x58e   :  { %v1471_v15 = vpop.eup %1470 }
 0x58f   :  { %727 = vrot.lane.b32.xlu2 %v1471_v15, %s1610_s1  ;;  %v1473_v4 = vpop.eup %1472 }
 0x590   :  { %v682_v55 = vadd.f32 1.0, %v1473_v4 }
 0x592   :  { %1474 = vrcp.f32 %v682_v55  ;;  %v709_v38 = vand.u32 2147483648, %v682_v55  ;;  %vm703_vm9 = vweird.f32 %v682_v55  ;;  %v707_v20 = vand.u32 2147483647, %v682_v55 }
 0x594   :  { %v710_v13 = vor.u32 1.1754944e-38, %v709_v38  ;;  %vm708_vm12 = vcmp.eq.f32.partialorder %v707_v20, 8.507059e+37 }
 0x598   :  { %v1475_v57 = vpop.eup %1474 }
 0x599   :  { %v699_v0 = vmul.f32 %v1475_v57, %v682_v55  ;;  %vm704_vm8 = vweird.f32 %v1475_v57 }
 0x59a   :  { %vm705_vm11 = vmor %vm703_vm9, %vm704_vm8 }
 0x59b   :  { %v700_v8 = vsub.f32 1.0, %v699_v0 }
 0x59d   :  { %v701_v12 = vmul.f32 %v1475_v57, %v700_v8 }
 0x59f   :  { %v702_v50 = vadd.f32 %v1475_v57, %v701_v12 }
 0x5a1   :  { %v706_v9 = vsel %vm705_vm11, %v1475_v57, %v702_v50 }
 0x5a2   :  { %v711_v54 = vsel %vm708_vm12, %v710_v13, %v706_v9 }
 0x5e9   :  { %v728_v16 = vpop.permute.xlu2 %727 }
 0x5ea   :  { %v2094_v10 = vmul.f32 %v728_v16, %v711_v54 }
 0x5ec   :  { %v731_v21 = vmax.f32 %v2064_v14, %v2094_v10  ;;  %1407 = vmatmul.msk.f32.vlgmr.msrb.gmra.mxu2 %vm425_vm10, %v2094_v10  ;;  %1408 = vmatmul.msk.f32.vlgmr.msra.gmra.mxu3 %vm425_vm10, %v2094_v10 }
 0x5ed   :  { %1151 = vmatpush.msrb.mxu2 %v1869_v56  ;;  %1171 = vmatpush.msra.mxu3 %v1536_v22  ;;  %v401_v22 = vadd.f32 %v2020_v30, %v2014_v17 }
 0x5ef   :  { %1152 = vmatpush.msrb.mxu2 %v1874_v58  ;;  %1172 = vmatpush.msra.mxu3 %v1537_v19 }
 0x5f1   :  { %1153 = vmatpush.msrb.mxu2 %v1879_v61  ;;  %1173 = vmatpush.msra.mxu3 %v1538_v40  ;;  %v399_v61 = vadd.f32 %v2020_v30, %v2012_v11 }
 0x5f3   :  { %1154 = vmatpush.msrb.mxu2 %v1890_v1  ;;  %1174 = vmatpush.msra.mxu3 %v1732_v18 }
 0x5f5   :  { %1155 = vmatpush.msrb.mxu2 %v1894_v3  ;;  %1175 = vmatpush.msra.mxu3 %v1770_v26 }
 0x5f7   :  { %1156 = vmatpush.msrb.mxu2 %v1901_v5  ;;  %1176 = vmatpush.msra.mxu3 %v1811_v36 }
 0x5f9   :  { %1157 = vmatpush.msrb.mxu2 %v1906_v6  ;;  %1177 = vmatpush.msra.mxu3 %v1838_v43 }
 0x5fb   :  { %1158 = vmatpush.msrb.mxu2 %v1914_v7  ;;  %1178 = vmatpush.msra.mxu3 %v1855_v48 }
 0x66f   :  { %v772_v56 = vpop.f32.mrf.mxu3  ;;  %v752_v26 = vpop.f32.mrf.mxu2 }
 0x670   :  { %v776_v58 = vadd.f32 %v772_v56, %v1993_v29  ;;  %v775_v36 = vadd.f32 %v752_v26, %v399_v61 }
 0x672   :  { %1476 = vtanh.f32 %v776_v58  ;;  %v1409_v1 = vmul.f32 -1.442695, %v775_v36  ;;  %v1410_v45 = vmul.f32 -1.442695, %v776_v58 }
 0x674   :  { %1478 = vpow2.f32 %v1409_v1 }
 0x678   :  { %v1477_v18 = vpop.eup %1476 }
 0x679   :  { %818 = vrot.lane.b32.xlu0 %v1477_v18, %s1610_s1 }
 0x67a   :  { %v1479_v3 = vpop.eup %1478 }
 0x67b   :  { %v783_v43 = vadd.f32 1.0, %v1479_v3 }
 0x67d   :  { %1480 = vrcp.f32 %v783_v43  ;;  %v796_v29 = vand.u32 2147483648, %v783_v43  ;;  %vm790_vm14 = vweird.f32 %v783_v43  ;;  %v794_v25 = vand.u32 2147483647, %v783_v43 }
 0x67f   :  { %v797_v32 = vor.u32 1.1754944e-38, %v796_v29  ;;  %vm795_vm1 = vcmp.eq.f32.partialorder %v794_v25, 8.507059e+37 }
 0x683   :  { %v1481_v5 = vpop.eup %1480 }
 0x684   :  { %v786_v6 = vmul.f32 %v1481_v5, %v783_v43  ;;  %vm791_vm13 = vweird.f32 %v1481_v5 }
 0x685   :  { %vm792_vm15 = vmor %vm790_vm14, %vm791_vm13 }
 0x686   :  { %v787_v48 = vsub.f32 1.0, %v786_v6 }
 0x688   :  { %v788_v7 = vmul.f32 %v1481_v5, %v787_v48 }
 0x68a   :  { %v789_v51 = vadd.f32 %v1481_v5, %v788_v7 }
 0x68c   :  { %v793_v28 = vsel %vm792_vm15, %v1481_v5, %v789_v51 }
 0x68d   :  { %v798_v33 = vsel %vm795_vm1, %v797_v32, %v793_v28 }
 0x68e   :  { %v816_v37 = vmul.f32 %v798_v33, %v2090_v31 }
 0x6eb   :  { %v819_v11 = vpop.permute.xlu0 %818 }
 0x6ec   :  { %v821_v24 = vmul.f32 %v819_v11, %v798_v33 }
 0x6ee   :  { %823 = vrot.lane.b32.xlu1 %v821_v24, %s1610_s1 }
 0x760   :  { %v824_v39 = vpop.permute.xlu1 %823 }
 0x761   :  { %v826_v44 = vadd.f32 %v824_v39, %v816_v37 }
 0x763   :  { %1482 = vtanh.f32 %v826_v44 }
 0x764   :  { %1484 = vpow2.f32 %v1410_v45 }
 0x769   :  { %v1483_v2 = vpop.eup %1482 }
 0x76a   :  { %829 = vrot.lane.b32.xlu2 %v1483_v2, %s1610_s1  ;;  %v1485_v46 = vpop.eup %1484 }
 0x76b   :  { %v784_v47 = vadd.f32 1.0, %v1485_v46 }
 0x76d   :  { %1486 = vrcp.f32 %v784_v47  ;;  %v811_v57 = vand.u32 2147483648, %v784_v47  ;;  %vm805_vm3 = vweird.f32 %v784_v47  ;;  %v809_v31 = vand.u32 2147483647, %v784_v47 }
 0x76f   :  { %v812_v8 = vor.u32 1.1754944e-38, %v811_v57  ;;  %vm810_vm5 = vcmp.eq.f32.partialorder %v809_v31, 8.507059e+37  ;;  %v403_v57 = vadd.f32 %v2020_v30, %v2016_v23 }
 0x773   :  { %v1487_v52 = vpop.eup %1486 }
 0x774   :  { %v801_v15 = vmul.f32 %v1487_v52, %v784_v47  ;;  %vm806_vm2 = vweird.f32 %v1487_v52 }
 0x775   :  { %vm807_vm4 = vmor %vm805_vm3, %vm806_vm2 }
 0x776   :  { %v802_v42 = vsub.f32 1.0, %v801_v15 }
 0x778   :  { %v803_v4 = vmul.f32 %v1487_v52, %v802_v42 }
 0x77a   :  { %v804_v55 = vadd.f32 %v1487_v52, %v803_v4 }
 0x77c   :  { %v808_v0 = vsel %vm807_vm4, %v1487_v52, %v804_v55 }
 0x77d   :  { %v813_v12 = vsel %vm810_vm5, %v812_v8, %v808_v0 }
 0x7c4   :  { %v830_v50 = vpop.permute.xlu2 %829 }
 0x7c5   :  { %v832_v38 = vmul.f32 %v830_v50, %v813_v12 }
 0x7c7   :  { %v2125_v20 = vmax.f32 %v731_v21, %v832_v38  ;;  %1411 = vmatmul.msk.f32.vlgmr.msrb.gmra.mxu0 %vm425_vm10, %v832_v38  ;;  %1412 = vmatmul.msk.f32.vlgmr.msrb.gmra.mxu1 %vm425_vm10, %v832_v38 }
 0x844   :  { %v874_v9 = vpop.f32.mrf.mxu1  ;;  %v854_v16 = vpop.f32.mrf.mxu0 }
 0x845   :  { %v878_v13 = vadd.f32 %v874_v9, %v1995_v34  ;;  %v877_v19 = vadd.f32 %v854_v16, %v401_v22 }
 0x847   :  { %1488 = vtanh.f32 %v878_v13  ;;  %v1413_v40 = vmul.f32 -1.442695, %v877_v19  ;;  %v1414_v51 = vmul.f32 -1.442695, %v878_v13 }
 0x849   :  { %1490 = vpow2.f32 %v1413_v40 }
 0x84d   :  { %v1489_v54 = vpop.eup %1488 }
 0x84e   :  { %920 = vrot.lane.b32.xlu0 %v1489_v54, %s1610_s1 }
 0x84f   :  { %v1491_v14 = vpop.eup %1490 }
 0x850   :  { %v885_v10 = vadd.f32 1.0, %v1491_v14 }
 0x852   :  { %1492 = vrcp.f32 %v885_v10  ;;  %v898_v34 = vand.u32 2147483648, %v885_v10  ;;  %vm892_vm7 = vweird.f32 %v885_v10  ;;  %v896_v61 = vand.u32 2147483647, %v885_v10 }
 0x854   :  { %v899_v1 = vor.u32 1.1754944e-38, %v898_v34  ;;  %vm897_vm9 = vcmp.eq.f32.partialorder %v896_v61, 8.507059e+37 }
 0x858   :  { %v1493_v21 = vpop.eup %1492 }
 0x859   :  { %v888_v56 = vmul.f32 %v1493_v21, %v885_v10  ;;  %vm893_vm6 = vweird.f32 %v1493_v21 }
 0x85a   :  { %vm894_vm8 = vmor %vm892_vm7, %vm893_vm6 }
 0x85b   :  { %v889_v58 = vsub.f32 1.0, %v888_v56 }
 0x85d   :  { %v890_v18 = vmul.f32 %v1493_v21, %v889_v58 }
 0x85f   :  { %v891_v26 = vadd.f32 %v1493_v21, %v890_v18 }
 0x861   :  { %v895_v36 = vsel %vm894_vm8, %v1493_v21, %v891_v26 }
 0x862   :  { %v900_v3 = vsel %vm897_vm9, %v899_v1, %v895_v36 }
 0x863   :  { %v918_v5 = vmul.f32 %v900_v3, %v826_v44 }
 0x8c0   :  { %v921_v17 = vpop.permute.xlu0 %920 }
 0x8c1   :  { %v923_v43 = vmul.f32 %v921_v17, %v900_v3 }
 0x8c3   :  { %925 = vrot.lane.b32.xlu1 %v923_v43, %s1610_s1 }
 0x935   :  { %v926_v6 = vpop.permute.xlu1 %925 }
 0x936   :  { %v928_v48 = vadd.f32 %v926_v6, %v918_v5 }
 0x938   :  { %1494 = vtanh.f32 %v928_v48 }
 0x939   :  { %1496 = vpow2.f32 %v1414_v51 }
 0x93e   :  { %v1495_v7 = vpop.eup %1494 }
 0x93f   :  { %931 = vrot.lane.b32.xlu2 %v1495_v7, %s1610_s1  ;;  %v1497_v29 = vpop.eup %1496 }
 0x940   :  { %v886_v25 = vadd.f32 1.0, %v1497_v29 }
 0x942   :  { %1498 = vrcp.f32 %v886_v25  ;;  %v913_v37 = vand.u32 2147483648, %v886_v25  ;;  %vm907_vm12 = vweird.f32 %v886_v25  ;;  %v911_v39 = vand.u32 2147483647, %v886_v25 }
 0x944   :  { %v914_v2 = vor.u32 1.1754944e-38, %v913_v37  ;;  %vm912_vm14 = vcmp.eq.f32.partialorder %v911_v39, 8.507059e+37 }
 0x948   :  { %v1499_v28 = vpop.eup %1498 }
 0x949   :  { %v903_v32 = vmul.f32 %v1499_v28, %v886_v25  ;;  %vm908_vm11 = vweird.f32 %v1499_v28 }
 0x94a   :  { %vm909_vm13 = vmor %vm907_vm12, %vm908_vm11 }
 0x94b   :  { %v904_v11 = vsub.f32 1.0, %v903_v32 }
 0x94d   :  { %v905_v33 = vmul.f32 %v1499_v28, %v904_v11 }
 0x94f   :  { %v906_v24 = vadd.f32 %v1499_v28, %v905_v33  ;;  %v405_v33 = vadd.f32 %v2020_v30, %v2018_v27 }
 0x951   :  { %v910_v44 = vsel %vm909_vm13, %v1499_v28, %v906_v24 }
 0x952   :  { %v915_v45 = vsel %vm912_vm14, %v914_v2, %v910_v44 }
 0x999   :  { %v932_v46 = vpop.permute.xlu2 %931 }
 0x99a   :  { %v934_v47 = vmul.f32 %v932_v46, %v915_v45 }
 0x99c   :  { %v935_v52 = vmax.f32 %v2125_v20, %v934_v47  ;;  %1415 = vmatmul.msk.f32.vlgmr.msra.gmra.mxu2 %vm425_vm10, %v934_v47  ;;  %1416 = vmatmul.msk.f32.vlgmr.msrb.gmra.mxu3 %vm425_vm10, %v934_v47 }
 0xa1f   :  { %v976_v15 = vpop.f32.mrf.mxu3  ;;  %v956_v55 = vpop.f32.mrf.mxu2 }
 0xa20   :  { %v980_v42 = vadd.f32 %v976_v15, %v2001_v41  ;;  %v979_v31 = vadd.f32 %v956_v55, %v403_v57 }
 0xa22   :  { %1500 = vtanh.f32 %v980_v42  ;;  %v1417_v0 = vmul.f32 -1.442695, %v979_v31  ;;  %v1418_v58 = vmul.f32 -1.442695, %v980_v42 }
 0xa24   :  { %1502 = vpow2.f32 %v1417_v0 }
 0xa28   :  { %v1501_v4 = vpop.eup %1500 }
 0xa29   :  { %1022 = vrot.lane.b32.xlu0 %v1501_v4, %s1610_s1 }
 0xa2a   :  { %v1503_v8 = vpop.eup %1502 }
 0xa2b   :  { %v987_v12 = vadd.f32 1.0, %v1503_v8 }
 0xa2d   :  { %1504 = vrcp.f32 %v987_v12  ;;  %v1000_v41 = vand.u32 2147483648, %v987_v12  ;;  %vm994_vm1 = vweird.f32 %v987_v12  ;;  %v998_v54 = vand.u32 2147483647, %v987_v12 }
 0xa2f   :  { %v1001_v22 = vor.u32 1.1754944e-38, %v1000_v41  ;;  %vm999_vm3 = vcmp.eq.f32.partialorder %v998_v54, 8.507059e+37 }
 0xa33   :  { %v1505_v50 = vpop.eup %1504 }
 0xa34   :  { %v990_v38 = vmul.f32 %v1505_v50, %v987_v12  ;;  %vm995_vm15 = vweird.f32 %v1505_v50 }
 0xa35   :  { %vm996_vm2 = vmor %vm994_vm1, %vm995_vm15 }
 0xa36   :  { %v991_v20 = vsub.f32 1.0, %v990_v38 }
 0xa38   :  { %v992_v9 = vmul.f32 %v1505_v50, %v991_v20 }
 0xa3a   :  { %v993_v13 = vadd.f32 %v1505_v50, %v992_v9 }
 0xa3c   :  { %v997_v16 = vsel %vm996_vm2, %v1505_v50, %v993_v13 }
 0xa3d   :  { %v1002_v19 = vsel %vm999_vm3, %v1001_v22, %v997_v16 }
 0xa3e   :  { %v1020_v14 = vmul.f32 %v1002_v19, %v928_v48 }
 0xa9b   :  { %v1023_v23 = vpop.permute.xlu0 %1022 }
 0xa9c   :  { %v1025_v40 = vmul.f32 %v1023_v23, %v1002_v19 }
 0xa9e   :  { %1027 = vrot.lane.b32.xlu1 %v1025_v40, %s1610_s1 }
 0xb10   :  { %v1028_v10 = vpop.permute.xlu1 %1027 }
 0xb11   :  { %v1030_v21 = vadd.f32 %v1028_v10, %v1020_v14 }
 0xb13   :  { %1506 = vtanh.f32 %v1030_v21 }
 0xb14   :  { %1508 = vpow2.f32 %v1418_v58 }
 0xb19   :  { %v1507_v56 = vpop.eup %1506 }
 0xb1a   :  { %1033 = vrot.lane.b32.xlu2 %v1507_v56, %s1610_s1  ;;  %v1509_v18 = vpop.eup %1508 }
 0xb1b   :  { %v988_v26 = vadd.f32 1.0, %v1509_v18 }
 0xb1d   :  { %1510 = vrcp.f32 %v988_v26  ;;  %v1015_v3 = vand.u32 2147483648, %v988_v26  ;;  %vm1009_vm5 = vweird.f32 %v988_v26  ;;  %v1013_v43 = vand.u32 2147483647, %v988_v26 }
 0xb1f   :  { %v1016_v6 = vor.u32 1.1754944e-38, %v1015_v3  ;;  %vm1014_vm7 = vcmp.eq.f32.partialorder %v1013_v43, 8.507059e+37 }
 0xb23   :  { %v1511_v34 = vpop.eup %1510 }
 0xb24   :  { %v1005_v61 = vmul.f32 %v1511_v34, %v988_v26  ;;  %vm1010_vm4 = vweird.f32 %v1511_v34 }
 0xb25   :  { %vm1011_vm6 = vmor %vm1009_vm5, %vm1010_vm4 }
 0xb26   :  { %v1006_v36 = vsub.f32 1.0, %v1005_v61 }
 0xb28   :  { %v1007_v1 = vmul.f32 %v1511_v34, %v1006_v36 }
 0xb2a   :  { %v1008_v17 = vadd.f32 %v1511_v34, %v1007_v1 }
 0xb2c   :  { %v1012_v5 = vsel %vm1011_vm6, %v1511_v34, %v1008_v17  ;;  %v343_v34 = vadd.f32 %v2052_v53, %v1997_v35 }
 0xb2d   :  { %v1017_v48 = vsel %vm1014_vm7, %v1016_v6, %v1012_v5 }
 0xb2e   :  { %v407_v36 = vadd.f32 %v2020_v30, %v343_v34 }
 0xb74   :  { %v1034_v7 = vpop.permute.xlu2 %1033 }
 0xb75   :  { %v1036_v51 = vmul.f32 %v1034_v7, %v1017_v48 }
 0xb77   :  { %v2144_v29 = vmax.f32 %v935_v52, %v1036_v51  ;;  %1419 = vmatmul.msk.f32.vlgmr.msra.gmra.mxu0 %vm425_vm10, %v1036_v51  ;;  %1420 = vmatmul.msk.f32.vlgmr.msra.gmra.mxu1 %vm425_vm10, %v1036_v51 }
 0xbf4   :  { %v1078_v25 = vpop.f32.mrf.mxu1  ;;  %v1058_v11 = vpop.f32.mrf.mxu0 }
 0xbf5   :  { %v1082_v28 = vadd.f32 %v1078_v25, %v2003_v49  ;;  %v1081_v24 = vadd.f32 %v1058_v11, %v405_v33  ;;  %v1261_v11 = vld [vmem:[#allocation8 + $0x1c0] sm:$0xff]  ;;  %v1260_v33 = vld [vmem:[#allocation8 + $0x1b0] sm:$0xff] }
 0xbf6   :  { %1273 = vmatpush.msrb.mxu0 %v1261_v11 }
 0xbf7   :  { %1512 = vtanh.f32 %v1082_v28  ;;  %v1421_v37 = vmul.f32 -1.442695, %v1081_v24  ;;  %v1422_v50 = vmul.f32 -1.442695, %v1082_v28  ;;  %v1253_v24 = vld [vmem:[#allocation8 + $0x140] sm:$0xff] }
 0xbf8   :  { %1300 = vmatpush.msrb.mxu1 %v1253_v24  ;;  %1274 = vmatpush.msrb.mxu0 %v1260_v33 }
 0xbf9   :  { %1514 = vpow2.f32 %v1421_v37  ;;  %v1259_v37 = vld [vmem:[#allocation8 + $0x1a0] sm:$0xff] }
 0xbfa   :  { %1275 = vmatpush.msrb.mxu0 %v1259_v37 }
 0xbfd   :  { %v1513_v32 = vpop.eup %1512 }
 0xbfe   :  { %1124 = vrot.lane.b32.xlu0 %v1513_v32, %s1610_s1 }
 0xbff   :  { %v1515_v39 = vpop.eup %1514 }
 0xc00   :  { %v1089_v44 = vadd.f32 1.0, %v1515_v39  ;;  %v1252_v39 = vld [vmem:[#allocation8 + $0x130] sm:$0xff] }
 0xc01   :  { %1301 = vmatpush.msrb.mxu1 %v1252_v39 }
 0xc02   :  { %1516 = vrcp.f32 %v1089_v44  ;;  %v1102_v49 = vand.u32 2147483648, %v1089_v44  ;;  %vm1096_vm9 = vweird.f32 %v1089_v44  ;;  %v1100_v15 = vand.u32 2147483647, %v1089_v44 }
 0xc04   :  { %v1103_v4 = vor.u32 1.1754944e-38, %v1102_v49  ;;  %vm1101_vm12 = vcmp.eq.f32.partialorder %v1100_v15, 8.507059e+37 }
 0xc08   :  { %v1517_v2 = vpop.eup %1516 }
 0xc09   :  { %v1092_v45 = vmul.f32 %v1517_v2, %v1089_v44  ;;  %vm1097_vm8 = vweird.f32 %v1517_v2  ;;  %v1258_v44 = vld [vmem:[#allocation8 + $0x190] sm:$0xff] }
 0xc0a   :  { %vm1098_vm11 = vmor %vm1096_vm9, %vm1097_vm8  ;;  %1276 = vmatpush.msrb.mxu0 %v1258_v44 }
 0xc0b   :  { %v1093_v46 = vsub.f32 1.0, %v1092_v45  ;;  %v1256_v45 = vld [vmem:[#allocation8 + $0x170] sm:$0xff] }
 0xc0d   :  { %v1094_v47 = vmul.f32 %v1517_v2, %v1093_v46 }
 0xc0f   :  { %v1095_v52 = vadd.f32 %v1517_v2, %v1094_v47 }
 0xc11   :  { %v1099_v42 = vsel %vm1098_vm11, %v1517_v2, %v1095_v52  ;;  %v1257_v2 = vld [vmem:[#allocation8 + $0x180] sm:$0xff] }
 0xc12   :  { %v1104_v55 = vsel %vm1101_vm12, %v1103_v4, %v1099_v42  ;;  %1277 = vmatpush.msrb.mxu0 %v1257_v2 }
 0xc13   :  { %v1122_v31 = vmul.f32 %v1104_v55, %v1030_v21 }
 0xc14   :  { %1278 = vmatpush.msrb.mxu0 %v1256_v45 }
 0xc70   :  { %v1125_v27 = vpop.permute.xlu0 %1124 }
 0xc71   :  { %v1127_v57 = vmul.f32 %v1125_v27, %v1104_v55  ;;  %v1249_v27 = vmax.f32 %v1248_v63, 0.0  ;;  %v1251_v55 = vld [vmem:[#allocation8 + $0x120] sm:$0xff] }
 0xc72   :  { %1302 = vmatpush.msrb.mxu1 %v1251_v55 }
 0xc73   :  { %1129 = vrot.lane.b32.xlu1 %v1127_v57, %s1610_s1  ;;  %v1255_v57 = vld [vmem:[#allocation8 + $0x160] sm:$0xff] }
 0xc74   :  { %1279 = vmatpush.msrb.mxu0 %v1255_v57 }
 0xce5   :  { %v1130_v0 = vpop.permute.xlu1 %1129 }
 0xce6   :  { %v2153_v8 = vadd.f32 %v1130_v0, %v1122_v31  ;;  %v1250_v31 = vld [vmem:[#allocation8 + $0x110] sm:$0xff] }
 0xce7   :  { %v1254_v0 = vld [vmem:[#allocation8 + $0x150] sm:$0xff]  ;;  %1303 = vmatpush.msrb.mxu1 %v1250_v31 }
 0xce8   :  { %1518 = vtanh.f32 %v2153_v8  ;;  %1280 = vmatpush.msrb.mxu0 %v1254_v0  ;;  %1428 = vmatmul.msk.f32.vlgmr.msrb.gmra.mxu1 %vm44_vm0, %v1249_v27  ;;  %vm1314_vm0 = vcmask 25600  }
 0xce9   :  { %1520 = vpow2.f32 %v1422_v50 }
 0xcee   :  { %v1519_v12 = vpop.eup %1518 }
 0xcef   :  { %1135 = vrot.lane.b32.xlu2 %v1519_v12, %s1610_s1  ;;  %v1521_v38 = vpop.eup %1520 }
 0xcf0   :  { %v1090_v20 = vadd.f32 1.0, %v1521_v38 }
 0xcf2   :  { %1522 = vrcp.f32 %v1090_v20  ;;  %v1117_v22 = vand.u32 2147483648, %v1090_v20  ;;  %vm1111_vm14 = vweird.f32 %v1090_v20  ;;  %v1115_v23 = vand.u32 2147483647, %v1090_v20 }
 0xcf4   :  { %v1118_v40 = vor.u32 1.1754944e-38, %v1117_v22  ;;  %vm1116_vm1 = vcmp.eq.f32.partialorder %v1115_v23, 8.507059e+37  ;;  %v1309_v22 = vld [vmem:[#allocation8 + $0x1d0] ss:$8 sm:$0x3] }
 0xcf8   :  { %v1523_v9 = vpop.eup %1522 }
 0xcf9   :  { %v1107_v13 = vmul.f32 %v1523_v9, %v1090_v20  ;;  %vm1112_vm13 = vweird.f32 %v1523_v9 }
 0xcfa   :  { %vm1113_vm15 = vmor %vm1111_vm14, %vm1112_vm13 }
 0xcfb   :  { %v1108_v41 = vsub.f32 1.0, %v1107_v13 }
 0xcfd   :  { %v1109_v54 = vmul.f32 %v1523_v9, %v1108_v41 }
 0xcff   :  { %v1110_v16 = vadd.f32 %v1523_v9, %v1109_v54 }
 0xd01   :  { %v1114_v19 = vsel %vm1113_vm15, %v1523_v9, %v1110_v16 }
 0xd02   :  { %v1119_v14 = vsel %vm1116_vm1, %v1118_v40, %v1114_v19  ;;  %v1311_v19 = vperm.slane %v1309_v22, 0 }
 0xd49   :  { %v1136_v10 = vpop.permute.xlu2 %1135 }
 0xd4a   :  { %v2157_v21 = vmul.f32 %v1136_v10, %v1119_v14 }
 0xd4c   :  { %1423 = vmatmul.msk.f32.vlgmr.msrb.gmra.mxu2 %vm425_vm10, %v2157_v21  ;;  %1424 = vmatmul.msk.f32.vlgmr.msra.gmra.mxu3 %vm425_vm10, %v2157_v21  ;;  %v1139_v56 = vmax.f32 %v2144_v29, %v2157_v21 }
 0xd65   :  { %v1305_v23 = vpop.f32.mrf.mxu1 }
 0xdcf   :  { %v1180_v58 = vpop.f32.mrf.mxu3  ;;  %v1160_v61 = vpop.f32.mrf.mxu2 }
 0xdd0   :  { %v1184_v18 = vadd.f32 %v1180_v58, %v2007_v60  ;;  %v1183_v1 = vadd.f32 %v1160_v61, %v407_v36 }
 0xdd2   :  { %1524 = vtanh.f32 %v1184_v18  ;;  %v1425_v17 = vmul.f32 -1.442695, %v1183_v1  ;;  %v1426_v15 = vmul.f32 -1.442695, %v1184_v18 }
 0xdd4   :  { %1526 = vpow2.f32 %v1425_v17 }
 0xdd8   :  { %v1525_v26 = vpop.eup %1524 }
 0xdd9   :  { %1226 = vrot.lane.b32.xlu0 %v1525_v26, %s1610_s1 }
 0xdda   :  { %v1527_v3 = vpop.eup %1526 }
 0xddb   :  { %v1191_v43 = vadd.f32 1.0, %v1527_v3 }
 0xddd   :  { %1528 = vrcp.f32 %v1191_v43  ;;  %v1204_v51 = vand.u32 2147483648, %v1191_v43  ;;  %vm1198_vm3 = vweird.f32 %v1191_v43  ;;  %v1202_v25 = vand.u32 2147483647, %v1191_v43 }
 0xddf   :  { %v1205_v53 = vor.u32 1.1754944e-38, %v1204_v51  ;;  %vm1203_vm5 = vcmp.eq.f32.partialorder %v1202_v25, 8.507059e+37 }
 0xde3   :  { %v1529_v5 = vpop.eup %1528 }
 0xde4   :  { %v1194_v6 = vmul.f32 %v1529_v5, %v1191_v43  ;;  %vm1199_vm2 = vweird.f32 %v1529_v5 }
 0xde5   :  { %vm1200_vm4 = vmor %vm1198_vm3, %vm1199_vm2 }
 0xde6   :  { %v1195_v48 = vsub.f32 1.0, %v1194_v6 }
 0xde8   :  { %v1196_v60 = vmul.f32 %v1529_v5, %v1195_v48 }
 0xdea   :  { %v1197_v7 = vadd.f32 %v1529_v5, %v1196_v60 }
 0xdec   :  { %v1201_v35 = vsel %vm1200_vm4, %v1529_v5, %v1197_v7 }
 0xded   :  { %v1206_v28 = vsel %vm1203_vm5, %v1205_v53, %v1201_v35 }
 0xdee   :  { %v1224_v46 = vmul.f32 %v1206_v28, %v2153_v8 }
 0xe4b   :  { %v1227_v30 = vpop.permute.xlu0 %1226 }
 0xe4c   :  { %v1229_v32 = vmul.f32 %v1227_v30, %v1206_v28 }
 0xe4e   :  { %1231 = vrot.lane.b32.xlu1 %v1229_v32, %s1610_s1 }
 0xec0   :  { %v1232_v47 = vpop.permute.xlu1 %1231 }
 0xec1   :  { %v1234_v52 = vadd.f32 %v1232_v47, %v1224_v46 }
 0xec3   :  { %1530 = vtanh.f32 %v1234_v52 }
 0xec4   :  { %1532 = vpow2.f32 %v1426_v15 }
 0xec9   :  { %v1531_v49 = vpop.eup %1530 }
 0xeca   :  { %1237 = vrot.lane.b32.xlu2 %v1531_v49, %s1610_s1  ;;  %v1533_v42 = vpop.eup %1532 }
 0xecb   :  { %v1192_v4 = vadd.f32 1.0, %v1533_v42 }
 0xecd   :  { %1534 = vrcp.f32 %v1192_v4  ;;  %v1219_v9 = vand.u32 2147483648, %v1192_v4  ;;  %vm1213_vm7 = vweird.f32 %v1192_v4  ;;  %v1217_v59 = vand.u32 2147483647, %v1192_v4 }
 0xecf   :  { %v1220_v63 = vor.u32 1.1754944e-38, %v1219_v9  ;;  %vm1218_vm9 = vcmp.eq.f32.partialorder %v1217_v59, 8.507059e+37 }
 0xed3   :  { %v1535_v8 = vpop.eup %1534 }
 0xed4   :  { %v1209_v12 = vmul.f32 %v1535_v8, %v1192_v4  ;;  %vm1214_vm6 = vweird.f32 %v1535_v8 }
 0xed5   :  { %vm1215_vm8 = vmor %vm1213_vm7, %vm1214_vm6 }
 0xed6   :  { %v1210_v50 = vsub.f32 1.0, %v1209_v12 }
 0xed8   :  { %v1211_v38 = vmul.f32 %v1535_v8, %v1210_v50 }
 0xeda   :  { %v1212_v20 = vadd.f32 %v1535_v8, %v1211_v38 }
 0xedc   :  { %v1216_v62 = vsel %vm1215_vm8, %v1535_v8, %v1212_v20 }
 0xedd   :  { %v1221_v13 = vsel %vm1218_vm9, %v1220_v63, %v1216_v62 }
 0xf24   :  { %v1238_v41 = vpop.permute.xlu2 %1237 }
 0xf25   :  { %v1240_v54 = vmul.f32 %v1238_v41, %v1221_v13 }
 0xf27   :  { %v1241_v16 = vmax.f32 %v1139_v56, %v1240_v54 }
 0xf29   :  { %1427 = vmatmul.msk.f32.vlgmr.msrb.gmra.mxu0 %vm425_vm10, %v1241_v16 }
 0xfa6   :  { %v1282_v40 = vpop.f32.mrf.mxu0 }
 0xfa7   :  { %v1306_v14 = vadd.f32 %v1305_v23, %v1282_v40 }
 0xfa9   :  { %v1313_v10 = vadd.f32 %v1311_v19, %v1306_v14 }
 0xfab   :  { %1315 = vst.msk [vmem:[#allocation9] sm:$0x3] %vm1314_vm0, %v1313_v10 }
 0xfac   :  { %1326 = dma.vmem_to_hbm [thread:$0]  %s1322_s28, 32, %s1324_s4, [#allocation6]  }
 0xfad   :  { %1603 = dma.done.wait [#allocation6], 32  }
 0xfae   :  { %1604 = vsyncadd [#allocation6], 4294967264 }
 0xfaf   :  { %1331 = vsyncpa [#allocation5], 1 }
 0xfb0   :  { %1332 = vsyncpa [#allocation6], 1 }
 0xfb1   :  { %1333 = vsyncpa [#allocation7], 1 }

</bundles_post_ra>
